<compile_context>
chip_gen: v7x
topology: tpu7x:2x2x1
jax: 0.10.0
libtpu: 0.0.40
codegen_flags: <defaults>
</compile_context>

<pallas_src>
import math

import jax
import jax.numpy as jnp
from jax.experimental import pallas as pl
from jax.experimental.pallas import tpu as pltpu

LEAKY_SLOPE = 0.2
_MAX_TILE_B = 512   # safe within v5e's 16 MiB scoped-VMEM default; fills v6e/v7x 256-wide MXU


def _round_up(n, m):
    return (n + m - 1) // m * m


def _dense(h, w_ref, b_ref):
    # bf16 x bf16 on the MXU with f32 accumulation; bias add in f32.
    return jnp.dot(h.astype(jnp.bfloat16), w_ref[...],
                   preferred_element_type=jnp.float32) + b_ref[...]


def _leaky_relu(h):
    return jnp.where(h >= 0.0, h, LEAKY_SLOPE * h)


def _sigmoid(h):
    # 1/(1+exp(-h)) with the reciprocal on the EUP (approx) instead of a VALU Newton divide.
    # Clamp so the approximate reciprocal cannot stray outside [0, 1].
    return jnp.clip(pl.reciprocal(1.0 + jnp.exp(-h), approx=True), 0.0, 1.0)


def vae_kernel(x_ref, eps_ref,
               w1, b1, w2, b2, wmv, bmv,        # encoder (mean | log_var heads fused)
               w3, b3, w4, b4, w5, b5,          # decoder
               xhat_ref, mean_ref, logvar_ref):
    z_dim = mean_ref.shape[-1]
    x = x_ref[...].astype(jnp.float32)

    # ---- encoder ----
    h = _leaky_relu(_dense(x, w1, b1))
    h = _leaky_relu(_dense(h, w2, b2))
    head = _dense(h, wmv, bmv)                  # one 2*Z-wide matmul instead of two Z-wide ones
    mean = head[:, :z_dim]
    log_var = head[:, z_dim:]

    # ---- reparameterization: z = mean + exp(0.5*log_var) * eps ----
    z = mean + jnp.exp(0.5 * log_var) * eps_ref[...].astype(jnp.float32)

    # ---- decoder ----
    d = _leaky_relu(_dense(z, w3, b3))
    d = _leaky_relu(_dense(d, w4, b4))
    x_hat = _sigmoid(_dense(d, w5, b5))

    xhat_ref[...] = x_hat.astype(xhat_ref.dtype)    # bf16 store: halves the biggest HBM stream
    mean_ref[...] = mean
    logvar_ref[...] = log_var


def _pick_tile_b(n):
    """Batch tile: large enough to fill the 256-wide MXU and amortize the ~0.35us grid-step
    overhead, small enough for v5e's scoped-VMEM default, and >=2 grid steps when the batch
    allows so both v7x TensorCores are used under "parallel" dimension semantics."""
    if n <= 32:
        return n                                              # one full-extent block, no padding
    if n <= 2 * _MAX_TILE_B:
        return min(_MAX_TILE_B, _round_up(-(-n // 2), 16))    # >=2 steps, 16-row (bf16) aligned
    return _MAX_TILE_B


@jax.jit
def vae_forward(x, eps, params):
    """x: (N, C, H, W) or (N, D); eps: (N, latent) (any float dtype);
    params: 6 x (W_bf16[in,out], b_f32[1,out]) for enc1, enc2, fused-head, dec1, dec2, dec_out.

    Returns (x_hat bf16 with x's shape, mean f32 (N, latent), log_var f32 (N, latent))."""
    orig_shape = x.shape
    N = orig_shape[0]
    d_in = int(math.prod(orig_shape[1:]))
    z_dim = eps.shape[1]

    # No host-side dtype casts or padding: DMA at stored dtype, cast inside the kernel;
    # Pallas masks the ragged last batch tile (if any) instead of a separate HBM pad pass.
    xf = x.reshape(N, d_in)

    tile_b = _pick_tile_b(N)
    grid = (pl.cdiv(N, tile_b),)

    in_specs = [
        pl.BlockSpec((tile_b, d_in), lambda i: (i, 0)),
        pl.BlockSpec((tile_b, z_dim), lambda i: (i, 0)),
    ]
    flat_args = [xf, eps]
    for (w, b) in params:
        in_specs.append(pl.BlockSpec(w.shape, lambda i: (0, 0)))   # VMEM-resident, not re-DMA'd
        in_specs.append(pl.BlockSpec(b.shape, lambda i: (0, 0)))
        flat_args.extend([w, b])

    out_shape = (
        jax.ShapeDtypeStruct((N, d_in), jnp.bfloat16),   # bf16 x_hat: largest output halved
        jax.ShapeDtypeStruct((N, z_dim), jnp.float32),
        jax.ShapeDtypeStruct((N, z_dim), jnp.float32),
    )
    out_specs = [
        pl.BlockSpec((tile_b, d_in), lambda i: (i, 0)),
        pl.BlockSpec((tile_b, z_dim), lambda i: (i, 0)),
        pl.BlockSpec((tile_b, z_dim), lambda i: (i, 0)),
    ]

    x_hat, mean, log_var = pl.pallas_call(
        vae_kernel,
        out_shape=out_shape,
        grid=grid,
        in_specs=in_specs,
        out_specs=out_specs,
        compiler_params=pltpu.CompilerParams(
            dimension_semantics=("parallel",),   # shard batch tiles across TensorCores (v7x)
        ),
    )(*flat_args)

    return x_hat.reshape(orig_shape), mean, log_var


def init_params(key, d_in, hidden, latent):
    """6 Linear layers: enc1, enc2, fused {mean|log_var} head, dec1, dec2, dec_out."""
    dims = [
        (d_in, hidden), (hidden, hidden), (hidden, 2 * latent),   # encoder (+ fused head)
        (latent, hidden), (hidden, hidden), (hidden, d_in),       # decoder
    ]
    params = []
    for cin, cout in dims:
        key, k1, k2 = jax.random.split(key, 3)
        w = (jax.random.normal(k1, (cin, cout), jnp.float32) / jnp.sqrt(cin)).astype(jnp.bfloat16)
        b = 0.01 * jax.random.normal(k2, (1, cout), jnp.float32)
        params.append((w, b))
    return params


if __name__ == "__main__":
    key = jax.random.PRNGKey(0)
    kp, kx, ke = jax.random.split(key, 3)

    # batch=2, channels=4, spatial=16 -> flattened input dim 1024 (multiple of 128, lane-dense)
    N, C, H, W = 2, 4, 16, 16
    D_IN = C * H * W
    HIDDEN = 256
    LATENT = 128

    x = jax.random.normal(kx, (N, C, H, W), jnp.float32)
    eps = jax.random.normal(ke, (N, LATENT), jnp.bfloat16)   # torch.randn_like(var) equivalent
    params = init_params(kp, D_IN, HIDDEN, LATENT)

    x_hat, mean, log_var = vae_forward(x, eps, params)
    (x_hat, mean, log_var) = jax.block_until_ready((x_hat, mean, log_var))

    assert x_hat.shape == (N, C, H, W), x_hat.shape
    assert mean.shape == (N, LATENT), mean.shape
    assert log_var.shape == (N, LATENT), log_var.shape
    xh32 = x_hat.astype(jnp.float32)
    assert jnp.all(jnp.isfinite(xh32)) and jnp.all(jnp.isfinite(mean)) and jnp.all(jnp.isfinite(log_var))
    assert jnp.all(xh32 >= 0.0) and jnp.all(xh32 <= 1.0)  # sigmoid range (clamped in-kernel)
    print("KERNEL_OK")
</pallas_src>

<mosaic_0001>
module attributes {stable_mosaic.version = 11 : i64} {
  func.func @vae_kernel(%arg0: i32, %arg1: memref<2x1024xf32, #tpu.memory_space<vmem>>, %arg2: memref<2x128xbf16, #tpu.memory_space<vmem>>, %arg3: memref<1024x256xbf16, #tpu.memory_space<vmem>>, %arg4: memref<1x256xf32, #tpu.memory_space<vmem>>, %arg5: memref<256x256xbf16, #tpu.memory_space<vmem>>, %arg6: memref<1x256xf32, #tpu.memory_space<vmem>>, %arg7: memref<256x256xbf16, #tpu.memory_space<vmem>>, %arg8: memref<1x256xf32, #tpu.memory_space<vmem>>, %arg9: memref<128x256xbf16, #tpu.memory_space<vmem>>, %arg10: memref<1x256xf32, #tpu.memory_space<vmem>>, %arg11: memref<256x256xbf16, #tpu.memory_space<vmem>>, %arg12: memref<1x256xf32, #tpu.memory_space<vmem>>, %arg13: memref<256x1024xbf16, #tpu.memory_space<vmem>>, %arg14: memref<1x1024xf32, #tpu.memory_space<vmem>>, %arg15: memref<2x1024xbf16, #tpu.memory_space<vmem>>, %arg16: memref<2x128xf32, #tpu.memory_space<vmem>>, %arg17: memref<2x128xf32, #tpu.memory_space<vmem>>) attributes {dimension_semantics = [#tpu.dimension_semantics<parallel>], iteration_bounds = array<i64: 1>, scalar_prefetch = 0 : i64, scratch_operands = 0 : i64, tpu.core_type = #tpu.core_type<tc>, window_params = [{transform_indices = @transform_0, window_bounds = array<i64: 2, 1024>}, {transform_indices = @transform_1, window_bounds = array<i64: 2, 128>}, {pipeline_mode = #tpu.pipeline_mode<synchronous>, transform_indices = @transform_2, window_bounds = array<i64: 1024, 256>}, {pipeline_mode = #tpu.pipeline_mode<synchronous>, transform_indices = @transform_3, window_bounds = array<i64: 1, 256>}, {pipeline_mode = #tpu.pipeline_mode<synchronous>, transform_indices = @transform_4, window_bounds = array<i64: 256, 256>}, {pipeline_mode = #tpu.pipeline_mode<synchronous>, transform_indices = @transform_5, window_bounds = array<i64: 1, 256>}, {pipeline_mode = #tpu.pipeline_mode<synchronous>, transform_indices = @transform_6, window_bounds = array<i64: 256, 256>}, {pipeline_mode = #tpu.pipeline_mode<synchronous>, transform_indices = @transform_7, window_bounds = array<i64: 1, 256>}, {pipeline_mode = #tpu.pipeline_mode<synchronous>, transform_indices = @transform_8, window_bounds = array<i64: 128, 256>}, {pipeline_mode = #tpu.pipeline_mode<synchronous>, transform_indices = @transform_9, window_bounds = array<i64: 1, 256>}, {pipeline_mode = #tpu.pipeline_mode<synchronous>, transform_indices = @transform_10, window_bounds = array<i64: 256, 256>}, {pipeline_mode = #tpu.pipeline_mode<synchronous>, transform_indices = @transform_11, window_bounds = array<i64: 1, 256>}, {pipeline_mode = #tpu.pipeline_mode<synchronous>, transform_indices = @transform_12, window_bounds = array<i64: 256, 1024>}, {pipeline_mode = #tpu.pipeline_mode<synchronous>, transform_indices = @transform_13, window_bounds = array<i64: 1, 1024>}, {transform_indices = @transform_14, window_bounds = array<i64: 2, 1024>}, {transform_indices = @transform_15, window_bounds = array<i64: 2, 128>}, {transform_indices = @transform_16, window_bounds = array<i64: 2, 128>}]} {
    %c0 = arith.constant 0 : index
    %c0_0 = arith.constant 0 : index
    %0 = vector.load %arg1[%c0, %c0_0] : memref<2x1024xf32, #tpu.memory_space<vmem>>, vector<2x1024xf32>
    %1 = arith.truncf %0 : vector<2x1024xf32> to vector<2x1024xbf16>
    %c0_1 = arith.constant 0 : index
    %c0_2 = arith.constant 0 : index
    %2 = vector.load %arg3[%c0_1, %c0_2] : memref<1024x256xbf16, #tpu.memory_space<vmem>>, vector<1024x256xbf16>
    %cst = arith.constant dense<0.000000e+00> : vector<2x256xf32>
    %3 = tpu.matmul %1, %2, %cst {dimension_numbers = #tpu.dot_dimension_numbers<[1], [0], [0], [1], [0, 0, 1, 1], [], []>} : vector<2x1024xbf16>, vector<1024x256xbf16>, vector<2x256xf32> -> vector<2x256xf32>
    %c0_3 = arith.constant 0 : index
    %c0_4 = arith.constant 0 : index
    %4 = vector.load %arg4[%c0_3, %c0_4] : memref<1x256xf32, #tpu.memory_space<vmem>>, vector<1x256xf32>
    %5 = vector.broadcast %4 : vector<1x256xf32> to vector<2x256xf32>
    %6 = arith.addf %3, %5 : vector<2x256xf32>
    %cst_5 = arith.constant 0.000000e+00 : f32
    %7 = vector.broadcast %cst_5 : f32 to vector<2x256xf32>
    %8 = arith.cmpf oge, %6, %7 : vector<2x256xf32>
    %cst_6 = arith.constant 2.000000e-01 : f32
    %9 = vector.broadcast %cst_6 : f32 to vector<2x256xf32>
    %10 = arith.mulf %9, %6 : vector<2x256xf32>
    %11 = arith.select %8, %6, %10 : vector<2x256xi1>, vector<2x256xf32>
    %12 = arith.truncf %11 : vector<2x256xf32> to vector<2x256xbf16>
    %c0_7 = arith.constant 0 : index
    %c0_8 = arith.constant 0 : index
    %13 = vector.load %arg5[%c0_7, %c0_8] : memref<256x256xbf16, #tpu.memory_space<vmem>>, vector<256x256xbf16>
    %cst_9 = arith.constant dense<0.000000e+00> : vector<2x256xf32>
    %14 = tpu.matmul %12, %13, %cst_9 {dimension_numbers = #tpu.dot_dimension_numbers<[1], [0], [0], [1], [0, 0, 1, 1], [], []>} : vector<2x256xbf16>, vector<256x256xbf16>, vector<2x256xf32> -> vector<2x256xf32>
    %c0_10 = arith.constant 0 : index
    %c0_11 = arith.constant 0 : index
    %15 = vector.load %arg6[%c0_10, %c0_11] : memref<1x256xf32, #tpu.memory_space<vmem>>, vector<1x256xf32>
    %16 = vector.broadcast %15 : vector<1x256xf32> to vector<2x256xf32>
    %17 = arith.addf %14, %16 : vector<2x256xf32>
    %cst_12 = arith.constant 0.000000e+00 : f32
    %18 = vector.broadcast %cst_12 : f32 to vector<2x256xf32>
    %19 = arith.cmpf oge, %17, %18 : vector<2x256xf32>
    %cst_13 = arith.constant 2.000000e-01 : f32
    %20 = vector.broadcast %cst_13 : f32 to vector<2x256xf32>
    %21 = arith.mulf %20, %17 : vector<2x256xf32>
    %22 = arith.select %19, %17, %21 : vector<2x256xi1>, vector<2x256xf32>
    %23 = arith.truncf %22 : vector<2x256xf32> to vector<2x256xbf16>
    %c0_14 = arith.constant 0 : index
    %c0_15 = arith.constant 0 : index
    %24 = vector.load %arg7[%c0_14, %c0_15] : memref<256x256xbf16, #tpu.memory_space<vmem>>, vector<256x256xbf16>
    %cst_16 = arith.constant dense<0.000000e+00> : vector<2x256xf32>
    %25 = tpu.matmul %23, %24, %cst_16 {dimension_numbers = #tpu.dot_dimension_numbers<[1], [0], [0], [1], [0, 0, 1, 1], [], []>} : vector<2x256xbf16>, vector<256x256xbf16>, vector<2x256xf32> -> vector<2x256xf32>
    %c0_17 = arith.constant 0 : index
    %c0_18 = arith.constant 0 : index
    %26 = vector.load %arg8[%c0_17, %c0_18] : memref<1x256xf32, #tpu.memory_space<vmem>>, vector<1x256xf32>
    %27 = vector.broadcast %26 : vector<1x256xf32> to vector<2x256xf32>
    %28 = arith.addf %25, %27 : vector<2x256xf32>
    %29 = vector.extract_strided_slice %28 {offsets = [0, 0], sizes = [2, 128], strides = [1, 1]} : vector<2x256xf32> to vector<2x128xf32>
    %30 = vector.extract_strided_slice %28 {offsets = [0, 128], sizes = [2, 128], strides = [1, 1]} : vector<2x256xf32> to vector<2x128xf32>
    %cst_19 = arith.constant 5.000000e-01 : f32
    %31 = vector.broadcast %cst_19 : f32 to vector<2x128xf32>
    %32 = arith.mulf %31, %30 : vector<2x128xf32>
    %33 = math.exp %32 : vector<2x128xf32>
    %c0_20 = arith.constant 0 : index
    %c0_21 = arith.constant 0 : index
    %34 = vector.load %arg2[%c0_20, %c0_21] : memref<2x128xbf16, #tpu.memory_space<vmem>>, vector<2x128xbf16>
    %35 = arith.extf %34 : vector<2x128xbf16> to vector<2x128xf32>
    %36 = arith.mulf %33, %35 : vector<2x128xf32>
    %37 = arith.addf %29, %36 : vector<2x128xf32>
    %38 = arith.truncf %37 : vector<2x128xf32> to vector<2x128xbf16>
    %c0_22 = arith.constant 0 : index
    %c0_23 = arith.constant 0 : index
    %39 = vector.load %arg9[%c0_22, %c0_23] : memref<128x256xbf16, #tpu.memory_space<vmem>>, vector<128x256xbf16>
    %cst_24 = arith.constant dense<0.000000e+00> : vector<2x256xf32>
    %40 = tpu.matmul %38, %39, %cst_24 {dimension_numbers = #tpu.dot_dimension_numbers<[1], [0], [0], [1], [0, 0, 1, 1], [], []>} : vector<2x128xbf16>, vector<128x256xbf16>, vector<2x256xf32> -> vector<2x256xf32>
    %c0_25 = arith.constant 0 : index
    %c0_26 = arith.constant 0 : index
    %41 = vector.load %arg10[%c0_25, %c0_26] : memref<1x256xf32, #tpu.memory_space<vmem>>, vector<1x256xf32>
    %42 = vector.broadcast %41 : vector<1x256xf32> to vector<2x256xf32>
    %43 = arith.addf %40, %42 : vector<2x256xf32>
    %cst_27 = arith.constant 0.000000e+00 : f32
    %44 = vector.broadcast %cst_27 : f32 to vector<2x256xf32>
    %45 = arith.cmpf oge, %43, %44 : vector<2x256xf32>
    %cst_28 = arith.constant 2.000000e-01 : f32
    %46 = vector.broadcast %cst_28 : f32 to vector<2x256xf32>
    %47 = arith.mulf %46, %43 : vector<2x256xf32>
    %48 = arith.select %45, %43, %47 : vector<2x256xi1>, vector<2x256xf32>
    %49 = arith.truncf %48 : vector<2x256xf32> to vector<2x256xbf16>
    %c0_29 = arith.constant 0 : index
    %c0_30 = arith.constant 0 : index
    %50 = vector.load %arg11[%c0_29, %c0_30] : memref<256x256xbf16, #tpu.memory_space<vmem>>, vector<256x256xbf16>
    %cst_31 = arith.constant dense<0.000000e+00> : vector<2x256xf32>
    %51 = tpu.matmul %49, %50, %cst_31 {dimension_numbers = #tpu.dot_dimension_numbers<[1], [0], [0], [1], [0, 0, 1, 1], [], []>} : vector<2x256xbf16>, vector<256x256xbf16>, vector<2x256xf32> -> vector<2x256xf32>
    %c0_32 = arith.constant 0 : index
    %c0_33 = arith.constant 0 : index
    %52 = vector.load %arg12[%c0_32, %c0_33] : memref<1x256xf32, #tpu.memory_space<vmem>>, vector<1x256xf32>
    %53 = vector.broadcast %52 : vector<1x256xf32> to vector<2x256xf32>
    %54 = arith.addf %51, %53 : vector<2x256xf32>
    %cst_34 = arith.constant 0.000000e+00 : f32
    %55 = vector.broadcast %cst_34 : f32 to vector<2x256xf32>
    %56 = arith.cmpf oge, %54, %55 : vector<2x256xf32>
    %cst_35 = arith.constant 2.000000e-01 : f32
    %57 = vector.broadcast %cst_35 : f32 to vector<2x256xf32>
    %58 = arith.mulf %57, %54 : vector<2x256xf32>
    %59 = arith.select %56, %54, %58 : vector<2x256xi1>, vector<2x256xf32>
    %60 = arith.truncf %59 : vector<2x256xf32> to vector<2x256xbf16>
    %c0_36 = arith.constant 0 : index
    %c0_37 = arith.constant 0 : index
    %61 = vector.load %arg13[%c0_36, %c0_37] : memref<256x1024xbf16, #tpu.memory_space<vmem>>, vector<256x1024xbf16>
    %cst_38 = arith.constant dense<0.000000e+00> : vector<2x1024xf32>
    %62 = tpu.matmul %60, %61, %cst_38 {dimension_numbers = #tpu.dot_dimension_numbers<[1], [0], [0], [1], [0, 0, 1, 1], [], []>} : vector<2x256xbf16>, vector<256x1024xbf16>, vector<2x1024xf32> -> vector<2x1024xf32>
    %c0_39 = arith.constant 0 : index
    %c0_40 = arith.constant 0 : index
    %63 = vector.load %arg14[%c0_39, %c0_40] : memref<1x1024xf32, #tpu.memory_space<vmem>>, vector<1x1024xf32>
    %64 = vector.broadcast %63 : vector<1x1024xf32> to vector<2x1024xf32>
    %65 = arith.addf %62, %64 : vector<2x1024xf32>
    %cst_41 = arith.constant 0.000000e+00 : f32
    %66 = vector.broadcast %cst_41 : f32 to vector<2x1024xf32>
    %67 = arith.subf %66, %65 : vector<2x1024xf32>
    %68 = math.exp %67 : vector<2x1024xf32>
    %cst_42 = arith.constant 1.000000e+00 : f32
    %69 = vector.broadcast %cst_42 : f32 to vector<2x1024xf32>
    %70 = arith.addf %69, %68 : vector<2x1024xf32>
    %71 = tpu.reciprocal %70 {approx = true} : vector<2x1024xf32> -> vector<2x1024xf32>
    %cst_43 = arith.constant 0.000000e+00 : f32
    %cst_44 = arith.constant 1.000000e+00 : f32
    %72 = vector.broadcast %cst_43 : f32 to vector<2x1024xf32>
    %73 = arith.maximumf %72, %71 : vector<2x1024xf32>
    %74 = vector.broadcast %cst_44 : f32 to vector<2x1024xf32>
    %75 = arith.minimumf %74, %73 : vector<2x1024xf32>
    %76 = arith.truncf %75 : vector<2x1024xf32> to vector<2x1024xbf16>
    %c0_45 = arith.constant 0 : index
    %c0_46 = arith.constant 0 : index
    %77 = vector.load %arg15[%c0_45, %c0_46] : memref<2x1024xbf16, #tpu.memory_space<vmem>>, vector<2x1024xbf16>
    tpu.vector_store %arg15[%c0_45, %c0_46], %76 {strides = array<i32>} : memref<2x1024xbf16, #tpu.memory_space<vmem>>, vector<2x1024xbf16>,
    %c0_47 = arith.constant 0 : index
    %c0_48 = arith.constant 0 : index
    %78 = vector.load %arg16[%c0_47, %c0_48] : memref<2x128xf32, #tpu.memory_space<vmem>>, vector<2x128xf32>
    tpu.vector_store %arg16[%c0_47, %c0_48], %29 {strides = array<i32>} : memref<2x128xf32, #tpu.memory_space<vmem>>, vector<2x128xf32>,
    %c0_49 = arith.constant 0 : index
    %c0_50 = arith.constant 0 : index
    %79 = vector.load %arg17[%c0_49, %c0_50] : memref<2x128xf32, #tpu.memory_space<vmem>>, vector<2x128xf32>
    tpu.vector_store %arg17[%c0_49, %c0_50], %30 {strides = array<i32>} : memref<2x128xf32, #tpu.memory_space<vmem>>, vector<2x128xf32>,
    return
  }
  func.func @transform_0(%arg0: i32) -> (i32, i32) {
    %c0_i32 = arith.constant 0 : i32
    %c0_i32_0 = arith.constant 0 : i32
    return %arg0, %c0_i32 : i32, i32
  }
  func.func @transform_1(%arg0: i32) -> (i32, i32) {
    %c0_i32 = arith.constant 0 : i32
    %c0_i32_0 = arith.constant 0 : i32
    return %arg0, %c0_i32 : i32, i32
  }
  func.func @transform_2(%arg0: i32) -> (i32, i32) {
    %c0_i32 = arith.constant 0 : i32
    %c0_i32_0 = arith.constant 0 : i32
    %c0_i32_1 = arith.constant 0 : i32
    return %c0_i32, %c0_i32_0 : i32, i32
  }
  func.func @transform_3(%arg0: i32) -> (i32, i32) {
    %c0_i32 = arith.constant 0 : i32
    %c0_i32_0 = arith.constant 0 : i32
    %c0_i32_1 = arith.constant 0 : i32
    return %c0_i32, %c0_i32_0 : i32, i32
  }
  func.func @transform_4(%arg0: i32) -> (i32, i32) {
    %c0_i32 = arith.constant 0 : i32
    %c0_i32_0 = arith.constant 0 : i32
    %c0_i32_1 = arith.constant 0 : i32
    return %c0_i32, %c0_i32_0 : i32, i32
  }
  func.func @transform_5(%arg0: i32) -> (i32, i32) {
    %c0_i32 = arith.constant 0 : i32
    %c0_i32_0 = arith.constant 0 : i32
    %c0_i32_1 = arith.constant 0 : i32
    return %c0_i32, %c0_i32_0 : i32, i32
  }
  func.func @transform_6(%arg0: i32) -> (i32, i32) {
    %c0_i32 = arith.constant 0 : i32
    %c0_i32_0 = arith.constant 0 : i32
    %c0_i32_1 = arith.constant 0 : i32
    return %c0_i32, %c0_i32_0 : i32, i32
  }
  func.func @transform_7(%arg0: i32) -> (i32, i32) {
    %c0_i32 = arith.constant 0 : i32
    %c0_i32_0 = arith.constant 0 : i32
    %c0_i32_1 = arith.constant 0 : i32
    return %c0_i32, %c0_i32_0 : i32, i32
  }
  func.func @transform_8(%arg0: i32) -> (i32, i32) {
    %c0_i32 = arith.constant 0 : i32
    %c0_i32_0 = arith.constant 0 : i32
    %c0_i32_1 = arith.constant 0 : i32
    return %c0_i32, %c0_i32_0 : i32, i32
  }
  func.func @transform_9(%arg0: i32) -> (i32, i32) {
    %c0_i32 = arith.constant 0 : i32
    %c0_i32_0 = arith.constant 0 : i32
    %c0_i32_1 = arith.constant 0 : i32
    return %c0_i32, %c0_i32_0 : i32, i32
  }
  func.func @transform_10(%arg0: i32) -> (i32, i32) {
    %c0_i32 = arith.constant 0 : i32
    %c0_i32_0 = arith.constant 0 : i32
    %c0_i32_1 = arith.constant 0 : i32
    return %c0_i32, %c0_i32_0 : i32, i32
  }
  func.func @transform_11(%arg0: i32) -> (i32, i32) {
    %c0_i32 = arith.constant 0 : i32
    %c0_i32_0 = arith.constant 0 : i32
    %c0_i32_1 = arith.constant 0 : i32
    return %c0_i32, %c0_i32_0 : i32, i32
  }
  func.func @transform_12(%arg0: i32) -> (i32, i32) {
    %c0_i32 = arith.constant 0 : i32
    %c0_i32_0 = arith.constant 0 : i32
    %c0_i32_1 = arith.constant 0 : i32
    return %c0_i32, %c0_i32_0 : i32, i32
  }
  func.func @transform_13(%arg0: i32) -> (i32, i32) {
    %c0_i32 = arith.constant 0 : i32
    %c0_i32_0 = arith.constant 0 : i32
    %c0_i32_1 = arith.constant 0 : i32
    return %c0_i32, %c0_i32_0 : i32, i32
  }
  func.func @transform_14(%arg0: i32) -> (i32, i32) {
    %c0_i32 = arith.constant 0 : i32
    %c0_i32_0 = arith.constant 0 : i32
    return %arg0, %c0_i32 : i32, i32
  }
  func.func @transform_15(%arg0: i32) -> (i32, i32) {
    %c0_i32 = arith.constant 0 : i32
    %c0_i32_0 = arith.constant 0 : i32
    return %arg0, %c0_i32 : i32, i32
  }
  func.func @transform_16(%arg0: i32) -> (i32, i32) {
    %c0_i32 = arith.constant 0 : i32
    %c0_i32_0 = arith.constant 0 : i32
    return %arg0, %c0_i32 : i32, i32
  }
}

</mosaic_0001>

<bundles_post_ra>
// kernel: vae_forward.1
= control target key start
LH: loop header
LB: loop body
LE: loop exit
PB: predicated region body
PF: predicated region fallthrough
CT: control target
= control target key end

     0   :  { %s4522_s0 = inlined_call_operand.vmem [shape: f32[2,1024], index: 0, kind: input, shape index: {}]   ;;  %s4523_s1 = inlined_call_operand.vmem [shape: bf16[2,128], index: 1, kind: input, shape index: {}]   ;;  %s4524_s2 = inlined_call_operand.hbm [shape: bf16[1024,256], index: 2, kind: input, shape index: {}]   ;;  %s4525_s3 = inlined_call_operand.vmem [shape: f32[1,256], index: 3, kind: input, shape index: {}]   ;;  %s4526_s4 = inlined_call_operand.hbm [shape: bf16[256,256], index: 4, kind: input, shape index: {}]   ;;  %s4527_s5 = inlined_call_operand.vmem [shape: f32[1,256], index: 5, kind: input, shape index: {}]   ;;  %s4528_s6 = inlined_call_operand.hbm [shape: bf16[256,256], index: 6, kind: input, shape index: {}]   ;;  %s4529_s7 = inlined_call_operand.vmem [shape: f32[1,256], index: 7, kind: input, shape index: {}]   ;;  %s4530_s8 = inlined_call_operand.vmem [shape: bf16[128,256], index: 8, kind: input, shape index: {}]   ;;  %s4531_s9 = inlined_call_operand.vmem [shape: f32[1,256], index: 9, kind: input, shape index: {}]   ;;  %s4532_s10 = inlined_call_operand.hbm [shape: bf16[256,256], index: 10, kind: input, shape index: {}]   ;;  %s4533_s11 = inlined_call_operand.vmem [shape: f32[1,256], index: 11, kind: input, shape index: {}]   ;;  %s4534_s12 = inlined_call_operand.hbm [shape: bf16[256,1024], index: 12, kind: input, shape index: {}]   ;;  %s4535_s13 = inlined_call_operand.vmem [shape: f32[1,1024], index: 13, kind: input, shape index: {}]   ;;  %s4536_s14 = inlined_call_operand.vmem [shape: bf16[2,1024], index: 14, kind: output, shape index: {0}]   ;;  %s4537_s15 = inlined_call_operand.hbm [shape: f32[2,128], index: 15, kind: output, shape index: {1}]   ;;  %s4538_s16 = inlined_call_operand.hbm [shape: f32[2,128], index: 16, kind: output, shape index: {2}]  }
   0x1   :  { %4540 = sst [smem:[#allocation19_spill]] %s4522_s0 }
   0x2   :  { %22 = vsyncpa [#allocation3], 0 }
   0x3   :  { %23 = vsyncpa [#allocation6], 0 }
   0x4   :  { %24 = vsyncpa [#allocation9], 0 }
   0x5   :  { %25 = vsyncpa [#allocation4], 0 }
   0x6   :  { %26 = vsyncpa [#allocation13], 0  ;;  %s4137_s21 = smov [#allocation5]   ;;  %s4138_s23 = smov [#allocation8]  }
   0x7   :  { %s50_s22 = sshll.u32 %s4137_s21, 4  ;;  %s82_s24 = sshll.u32 %s4138_s23, 4  ;;  %s51_s22 = int_to_ptr.vmem [resolvable:$true] %s50_s22  ;;  %s4236_s24 = int_to_ptr.vmem [resolvable:$true] %s82_s24 }
   0x8   :  { %s3973_s27 = scalar_lea.hbm %s4526_s4, 4096 }
   0x9   :  { %p3974_p0 = scmp.ne.s32.totalorder %s4526_s4, %s3973_s27  ;;  %p3977_p1 = scmp.lt.u32.totalorder %s3973_s27, %s4526_s4 }
   0xb   :  { %p3979_p2 = pnand %p3977_p1, %p3974_p0 }
   0xd   :  { %3982 = shalt.err (!%p3979_p2)
}
   0xe   :  { %s3983_s17 = scalar_lea.vmem %s51_s22, 4096  ;;  %p3988_p4 = scmp.lt.s32.totalorder %s51_s22, %s51_s22 }
   0xf   :  { %p3984_p3 = scmp.ne.s32.totalorder %s51_s22, %s3983_s17  ;;  %p3989_p5 = scmp.lt.s32.totalorder %s3983_s17, %s3983_s17 }
  0x11   :  { %p3990_p6 = por %p3989_p5, %p3988_p4 }
  0x13   :  { %p3991_p7 = pnand %p3990_p6, %p3984_p3 }
  0x15   :  { %3994 = shalt.err (!%p3991_p7)
}
  0x16   :  { %s4139_s18 = smov 128   ;;  %s4140_s19 = smov 8  }
  0x17   :  { %56 = dma.hbm_to_vmem [thread:$0]  %s4526_s4, 4096, %s51_s22, [#allocation6], %s4139_s18, %s4139_s18, %s4140_s19  }
  0x18   :  { %s3995_s26 = scalar_lea.hbm %s4532_s10, 4096 }
  0x19   :  { %p3996_p8 = scmp.ne.s32.totalorder %s4532_s10, %s3995_s26  ;;  %p3999_p9 = scmp.lt.u32.totalorder %s3995_s26, %s4532_s10 }
  0x1b   :  { %p4001_p10 = pnand %p3999_p9, %p3996_p8 }
  0x1d   :  { %4004 = shalt.err (!%p4001_p10)
}
  0x1e   :  { %s4005_s0 = scalar_lea.vmem %s4236_s24, 4096  ;;  %p4010_p12 = scmp.lt.s32.totalorder %s4236_s24, %s4236_s24 }
  0x1f   :  { %p4006_p11 = scmp.ne.s32.totalorder %s4236_s24, %s4005_s0  ;;  %p4011_p13 = scmp.lt.s32.totalorder %s4005_s0, %s4005_s0 }
  0x21   :  { %p4012_p0 = por %p4011_p13, %p4010_p12 }
  0x23   :  { %p4013_p1 = pnand %p4012_p0, %p4006_p11 }
  0x25   :  { %4016 = shalt.err (!%p4013_p1)
}
  0x26   :  { %88 = dma.hbm_to_vmem [thread:$0]  %s4532_s10, 4096, %s4236_s24, [#allocation9], %s4139_s18, %s4139_s18, %s4140_s19  }
  0x27   :  { %s4141_s17 = smov [#allocation2]   ;;  %s4142_s21 = smov [#allocation7]  }
  0x28   :  { %s36_s20 = sshll.u32 %s4141_s17, 4  ;;  %s64_s23 = sshll.u32 %s4142_s21, 4  ;;  %s37_s20 = int_to_ptr.vmem [resolvable:$true] %s36_s20  ;;  %s4273_s23 = int_to_ptr.vmem [resolvable:$true] %s64_s23 }
  0x29   :  { %s4017_s27 = scalar_lea.hbm %s4524_s2, 16384 }
  0x2a   :  { %p4018_p2 = scmp.ne.s32.totalorder %s4524_s2, %s4017_s27  ;;  %p4021_p3 = scmp.lt.u32.totalorder %s4017_s27, %s4524_s2 }
  0x2c   :  { %p4023_p4 = pnand %p4021_p3, %p4018_p2 }
  0x2e   :  { %4026 = shalt.err (!%p4023_p4)
}
  0x2f   :  { %s4027_s10 = scalar_lea.vmem %s37_s20, 16384  ;;  %p4032_p6 = scmp.lt.s32.totalorder %s37_s20, %s37_s20 }
  0x30   :  { %p4028_p5 = scmp.ne.s32.totalorder %s37_s20, %s4027_s10  ;;  %p4033_p7 = scmp.lt.s32.totalorder %s4027_s10, %s4027_s10 }
  0x32   :  { %p4034_p8 = por %p4033_p7, %p4032_p6 }
  0x34   :  { %p4035_p9 = pnand %p4034_p8, %p4028_p5 }
  0x36   :  { %4038 = shalt.err (!%p4035_p9)
}
  0x37   :  { %42 = dma.hbm_to_vmem [thread:$0]  %s4524_s2, 16384, %s37_s20, [#allocation3], %s4139_s18, %s4139_s18, %s4140_s19  }
  0x38   :  { %s4039_s21 = scalar_lea.hbm %s4528_s6, 4096 }
  0x39   :  { %p4040_p10 = scmp.ne.s32.totalorder %s4528_s6, %s4039_s21  ;;  %p4043_p11 = scmp.lt.u32.totalorder %s4039_s21, %s4528_s6 }
  0x3b   :  { %p4045_p12 = pnand %p4043_p11, %p4040_p10 }
  0x3d   :  { %4048 = shalt.err (!%p4045_p12)
}
  0x3e   :  { %s4049_s29 = scalar_lea.vmem %s4273_s23, 4096  ;;  %p4054_p0 = scmp.lt.s32.totalorder %s4273_s23, %s4273_s23 }
  0x3f   :  { %p4050_p13 = scmp.ne.s32.totalorder %s4273_s23, %s4049_s29  ;;  %p4055_p1 = scmp.lt.s32.totalorder %s4049_s29, %s4049_s29 }
  0x41   :  { %p4056_p2 = por %p4055_p1, %p4054_p0 }
  0x43   :  { %p4057_p3 = pnand %p4056_p2, %p4050_p13 }
  0x45   :  { %4060 = shalt.err (!%p4057_p3)
}
  0x46   :  { %70 = dma.hbm_to_vmem [thread:$0]  %s4528_s6, 4096, %s4273_s23, [#allocation6], %s4139_s18, %s4139_s18, %s4140_s19  }
  0x47   :  { %s4143_s30 = smov [#allocation10]   ;;  %s4061_s4 = scalar_lea.hbm %s4534_s12, 16384 }
  0x48   :  { %s96_s0 = sshll.u32 %s4143_s30, 4  ;;  %p4062_p4 = scmp.ne.s32.totalorder %s4534_s12, %s4061_s4  ;;  %s97_s0 = int_to_ptr.vmem [resolvable:$true] %s96_s0 }
  0x49   :  { %p4065_p5 = scmp.lt.u32.totalorder %s4061_s4, %s4534_s12 }
  0x4b   :  { %p4067_p6 = pnand %p4065_p5, %p4062_p4 }
  0x4d   :  { %4070 = shalt.err (!%p4067_p6)
}
  0x4e   :  { %s4071_s26 = scalar_lea.vmem %s97_s0, 16384  ;;  %p4076_p8 = scmp.lt.s32.totalorder %s97_s0, %s97_s0 }
  0x4f   :  { %p4072_p7 = scmp.ne.s32.totalorder %s97_s0, %s4071_s26  ;;  %p4077_p9 = scmp.lt.s32.totalorder %s4071_s26, %s4071_s26 }
  0x51   :  { %p4078_p10 = por %p4077_p9, %p4076_p8 }
  0x53   :  { %p4079_p11 = pnand %p4078_p10, %p4072_p7 }
  0x55   :  { %4082 = shalt.err (!%p4079_p11)
}
  0x56   :  { %s4144_s6 = smov 512   ;;  %s4145_s18 = smov 32  }
  0x57   :  { %102 = dma.hbm_to_vmem [thread:$0]  %s4534_s12, 16384, %s97_s0, [#allocation9], %s4144_s6, %s4144_s6, %s4145_s18  }
  0x58   :  { %4127 = dma.done.wait [#allocation3], 16384  }
  0x59   :  { %4128 = vsyncadd [#allocation3], 4294950912 }
  0x5a   :  { %4129 = dma.done.wait [#allocation6], 8192  }
  0x5b   :  { %4130 = vsyncadd [#allocation6], 4294959104 }
  0x5c   :  { %4131 = dma.done.wait [#allocation9], 20480  }
  0x5d   :  { %4132 = vsyncadd [#allocation9], 4294946816  ;;  %v3577_v0 = vld [vmem:[#allocation2 + $0x4] ss:$8 sps:$4 sm:$0xff]   ;;  %v3579_v1 = vld [vmem:[#allocation2] ss:$8 sps:$4 sm:$0xff]   ;;  %v129_v9 = vlaneseq }
  0x5e   :  { %955 = vmatprep.subr.bf16.mxu0 %v3577_v0  ;;  %v3580_v2 = vld [vmem:[#allocation2 + $0x14] ss:$8 sps:$4 sm:$0xff]   ;;  %v3582_v3 = vld [vmem:[#allocation2 + $0x10] ss:$8 sps:$4 sm:$0xff]   ;;  %v3583_v4 = vld [vmem:[#allocation2 + $0x24] ss:$8 sps:$4 sm:$0xff]  }
  0x5f   :  { %956 = vmatpush1.bf16.msra.mxu0 %v3579_v1  ;;  %v3585_v5 = vld [vmem:[#allocation2 + $0x20] ss:$8 sps:$4 sm:$0xff]   ;;  %v3586_v6 = vld [vmem:[#allocation2 + $0x34] ss:$8 sps:$4 sm:$0xff]   ;;  %v4146_v7 = vmov 1983009808  }
  0x60   :  { %957 = vmatprep.subr.bf16.mxu0 %v3580_v2  ;;  %v127_v8 = vunpack.c.l.s4 %v4146_v7  ;;  %v3588_v10 = vld [vmem:[#allocation2 + $0x30] ss:$8 sps:$4 sm:$0xff]   ;;  %v3589_v11 = vld [vmem:[#allocation2 + $0x44] ss:$8 sps:$4 sm:$0xff]   ;;  %v4322_v13 = vshrl.u32 %v129_v9, 7  ;;  %s4541_s28 = sld [smem:[#allocation19_spill]] }
  0x61   :  { %v3591_v14 = vld [vmem:[#allocation2 + $0x40] ss:$8 sps:$4 sm:$0xff]   ;;  %v3592_v15 = vld [vmem:[#allocation2 + $0x54] ss:$8 sps:$4 sm:$0xff]   ;;  %v3594_v17 = vld [vmem:[#allocation2 + $0x50] ss:$8 sps:$4 sm:$0xff]  }
  0x62   :  { %v128_v12 = vunpack.c.0.s8 %v127_v8  ;;  %v3595_v18 = vld [vmem:[#allocation2 + $0x64] ss:$8 sps:$4 sm:$0xff]   ;;  %v3597_v21 = vld [vmem:[#allocation2 + $0x60] ss:$8 sps:$4 sm:$0xff]   ;;  %v3598_v22 = vld [vmem:[#allocation2 + $0x74] ss:$8 sps:$4 sm:$0xff]  }
  0x63   :  { %958 = vmatpush1.bf16.msra.mxu0 %v3582_v3  ;;  %v3600_v25 = vld [vmem:[#allocation2 + $0x70] ss:$8 sps:$4 sm:$0xff]   ;;  %v3601_v26 = vld [vmem:[#allocation2 + $0x84] ss:$8 sps:$4 sm:$0xff]   ;;  %v3603_v27 = vld [vmem:[#allocation2 + $0x80] ss:$8 sps:$4 sm:$0xff]  }
  0x64   :  { %959 = vmatprep.subr.bf16.mxu0 %v3583_v4  ;;  %v4325_v16 = vsub.s32 %v128_v12, %v4322_v13  ;;  %v3604_v28 = vld [vmem:[#allocation2 + $0x94] ss:$8 sps:$4 sm:$0xff]   ;;  %v3606_v29 = vld [vmem:[#allocation2 + $0x90] ss:$8 sps:$4 sm:$0xff]   ;;  %v3607_v30 = vld [vmem:[#allocation2 + $0xa4] ss:$8 sps:$4 sm:$0xff]  }
  0x65   :  { %v3609_v31 = vld [vmem:[#allocation2 + $0xa0] ss:$8 sps:$4 sm:$0xff]   ;;  %v3610_v32 = vld [vmem:[#allocation2 + $0xb4] ss:$8 sps:$4 sm:$0xff]   ;;  %v3612_v33 = vld [vmem:[#allocation2 + $0xb0] ss:$8 sps:$4 sm:$0xff]  }
  0x66   :  { %v121_v19 = vld [vmem:[%s4541_s28] sm:$0xff]  ;;  %v3616_v36 = vld [vmem:[#allocation2 + $0xd4] ss:$8 sps:$4 sm:$0xff]   ;;  %v3618_v37 = vld [vmem:[#allocation2 + $0xd0] ss:$8 sps:$4 sm:$0xff]  }
  0x67   :  { %960 = vmatpush1.bf16.msra.mxu0 %v3585_v5  ;;  %v132_v20 = vrot.slane %v121_v19, %v4325_v16  ;;  %v3613_v34 = vld [vmem:[#allocation2 + $0xc4] ss:$8 sps:$4 sm:$0xff]   ;;  %v3615_v35 = vld [vmem:[#allocation2 + $0xc0] ss:$8 sps:$4 sm:$0xff]   ;;  %v125_v38 = vcombine.high %v121_v19, %v121_v19  ;;  %v3622_v42 = vld [vmem:[#allocation2 + $0xf4] ss:$8 sps:$4 sm:$0xff]  }
  0x68   :  { %961 = vmatprep.subr.bf16.mxu0 %v3586_v6  ;;  %v3619_v39 = vld [vmem:[#allocation2 + $0xe4] ss:$8 sps:$4 sm:$0xff]   ;;  %v3621_v40 = vld [vmem:[#allocation2 + $0xe0] ss:$8 sps:$4 sm:$0xff]   ;;  %v3624_v43 = vld [vmem:[#allocation2 + $0xf0] ss:$8 sps:$4 sm:$0xff]  }
  0x69   :  { %v140_v23 = vcombine.high %v132_v20, %v132_v20  ;;  %v4332_v41 = vrot.slane %v125_v38, %v4325_v16  ;;  %v3628_v45 = vld [vmem:[#allocation2 + $0x104] ss:$8 sps:$4 sm:$0xff]   ;;  %v167_v46 = vpack.c.bf16 %v132_v20, %v132_v20  ;;  %v3626_v47 = vld [vmem:[#allocation2 + $0x100] ss:$8 sps:$4 sm:$0xff]   ;;  %v3631_v49 = vld [vmem:[#allocation2 + $0x114] ss:$8 sps:$4 sm:$0xff]  }
  0x6a   :  { %v3629_v50 = vld [vmem:[#allocation2 + $0x110] ss:$8 sps:$4 sm:$0xff]   ;;  %v3634_v51 = vld [vmem:[#allocation2 + $0x124] ss:$8 sps:$4 sm:$0xff]   ;;  %v3632_v52 = vld [vmem:[#allocation2 + $0x120] ss:$8 sps:$4 sm:$0xff]  }
  0x6b   :  { %962 = vmatpush1.bf16.msra.mxu0 %v3588_v10  ;;  %v168_v24 = vpack.c.bf16 %v140_v23, %v140_v23  ;;  %v141_v44 = vcombine.high %v4332_v41, %v4332_v41  ;;  %v3637_v53 = vld [vmem:[#allocation2 + $0x134] ss:$8 sps:$4 sm:$0xff]   ;;  %v3635_v54 = vld [vmem:[#allocation2 + $0x130] ss:$8 sps:$4 sm:$0xff]   ;;  %v3640_v55 = vld [vmem:[#allocation2 + $0x144] ss:$8 sps:$4 sm:$0xff]  }
  0x6c   :  { %963 = vmatprep.subr.bf16.mxu0 %v3589_v11  ;;  %v3638_v56 = vld [vmem:[#allocation2 + $0x140] ss:$8 sps:$4 sm:$0xff]   ;;  %v3643_v57 = vld [vmem:[#allocation2 + $0x154] ss:$8 sps:$4 sm:$0xff]   ;;  %v3641_v58 = vld [vmem:[#allocation2 + $0x150] ss:$8 sps:$4 sm:$0xff]  }
  0x6d   :  { %987 = vmatprep.mubr.bf16.mxu0 %v168_v24  ;;  %v170_v48 = vpack.c.bf16 %v141_v44, %v141_v44  ;;  %v3646_v59 = vld [vmem:[#allocation2 + $0x164] ss:$8 sps:$4 sm:$0xff]   ;;  %v3644_v60 = vld [vmem:[#allocation2 + $0x160] ss:$8 sps:$4 sm:$0xff]   ;;  %v3649_v61 = vld [vmem:[#allocation2 + $0x174] ss:$8 sps:$4 sm:$0xff]  }
  0x6e   :  { %v3647_v62 = vld [vmem:[#allocation2 + $0x170] ss:$8 sps:$4 sm:$0xff]   ;;  %v3652_v63 = vld [vmem:[#allocation2 + $0x184] ss:$8 sps:$4 sm:$0xff]   ;;  %v3650_v0 = vld [vmem:[#allocation2 + $0x180] ss:$8 sps:$4 sm:$0xff]  }
  0x6f   :  { %964 = vmatpush1.bf16.msra.mxu0 %v3591_v14  ;;  %v3655_v1 = vld [vmem:[#allocation2 + $0x194] ss:$8 sps:$4 sm:$0xff]   ;;  %v3653_v2 = vld [vmem:[#allocation2 + $0x190] ss:$8 sps:$4 sm:$0xff]   ;;  %v3658_v3 = vld [vmem:[#allocation2 + $0x1a4] ss:$8 sps:$4 sm:$0xff]  }
  0x70   :  { %965 = vmatprep.subr.bf16.mxu0 %v3592_v15  ;;  %v3656_v4 = vld [vmem:[#allocation2 + $0x1a0] ss:$8 sps:$4 sm:$0xff]   ;;  %v3661_v5 = vld [vmem:[#allocation2 + $0x1b4] ss:$8 sps:$4 sm:$0xff]   ;;  %v3659_v6 = vld [vmem:[#allocation2 + $0x1b0] ss:$8 sps:$4 sm:$0xff]  }
  0x71   :  { %v3664_v7 = vld [vmem:[#allocation2 + $0x1c4] ss:$8 sps:$4 sm:$0xff]   ;;  %v3662_v8 = vld [vmem:[#allocation2 + $0x1c0] ss:$8 sps:$4 sm:$0xff]   ;;  %v3667_v9 = vld [vmem:[#allocation2 + $0x1d4] ss:$8 sps:$4 sm:$0xff]  }
  0x72   :  { %v3665_v10 = vld [vmem:[#allocation2 + $0x1d0] ss:$8 sps:$4 sm:$0xff]   ;;  %v3670_v11 = vld [vmem:[#allocation2 + $0x1e4] ss:$8 sps:$4 sm:$0xff]   ;;  %v3668_v14 = vld [vmem:[#allocation2 + $0x1e0] ss:$8 sps:$4 sm:$0xff]  }
  0x73   :  { %966 = vmatpush1.bf16.msra.mxu0 %v3594_v17  ;;  %v4339_v12 = vld [vmem:[%s4541_s28 + $0x8] sm:$0xff]  ;;  %v3673_v15 = vld [vmem:[#allocation2 + $0x1f4] ss:$8 sps:$4 sm:$0xff]   ;;  %v3782_v38 = vld [vmem:[#allocation5 + $0x30] ss:$8 sps:$4 sm:$0xff]   ;;  %s4149_s28 = smov [#allocation12]  }
  0x74   :  { %967 = vmatprep.subr.bf16.mxu0 %v3595_v18  ;;  %v4343_v17 = vrot.slane %v4339_v12, %v4325_v16  ;;  %v3671_v18 = vld [vmem:[#allocation2 + $0x1f0] ss:$8 sps:$4 sm:$0xff]   ;;  %v3676_v20 = vld [vmem:[#allocation2 + $0x204] ss:$8 sps:$4 sm:$0xff]   ;;  %v3679_v24 = vld [vmem:[#allocation2 + $0x214] ss:$8 sps:$4 sm:$0xff]  }
  0x75   :  { %v3689_v44 = vld [vmem:[#allocation2 + $0x250] ss:$8 sps:$4 sm:$0xff]   ;;  %s3160_s29 = sshll.u32 %s4149_s28, 4  ;;  %s3161_s29 = int_to_ptr.vmem [resolvable:$true] %s3160_s29 }
  0x76   :  { %v157_v19 = vcombine.high %v4343_v17, %v4343_v17 }
  0x77   :  { %968 = vmatpush1.bf16.msra.mxu0 %v3597_v21  ;;  %v169_v21 = vpack.c.bf16 %v4332_v41, %v4332_v41  ;;  %v3691_v41 = vld [vmem:[#allocation2 + $0x254] ss:$8 sps:$4 sm:$0xff]  }
  0x78   :  { %969 = vmatprep.subr.bf16.mxu0 %v3598_v22  ;;  %v3674_v22 = vld [vmem:[#allocation2 + $0x200] ss:$8 sps:$4 sm:$0xff]   ;;  %v172_v23 = vpack.c.bf16 %v157_v19, %v157_v19  ;;  %v3812_v19 = vld [vmem:[#allocation5 + $0xd0] ss:$8 sps:$4 sm:$0xff]  }
  0x7b   :  { %970 = vmatpush1.bf16.msra.mxu0 %v3600_v25  ;;  %v3771_v25 = vld [vmem:[#allocation5 + $0x4] ss:$8 sps:$4 sm:$0xff]  }
  0x7c   :  { %971 = vmatprep.subr.bf16.mxu0 %v3601_v26  ;;  %v3773_v26 = vld [vmem:[#allocation5] ss:$8 sps:$4 sm:$0xff]   ;;  %1331 = vmatprep.subr.bf16.mxu1 %v3771_v25  ;;  %v171_v25 = vpack.c.bf16 %v4343_v17, %v4343_v17 }
  0x7d   :  { %1332 = vmatpush1.bf16.msra.mxu1 %v3773_v26  ;;  %v3722_v26 = vld [vmem:[#allocation2 + $0x300] ss:$8 sps:$4 sm:$0xff]  }
  0x7e   :  { %v3734_v17 = vld [vmem:[#allocation2 + $0x340] ss:$8 sps:$4 sm:$0xff]  }
  0x7f   :  { %972 = vmatpush1.bf16.msra.mxu0 %v3603_v27  ;;  %v3774_v27 = vld [vmem:[#allocation5 + $0x14] ss:$8 sps:$4 sm:$0xff]  }
  0x80   :  { %973 = vmatprep.subr.bf16.mxu0 %v3604_v28  ;;  %v3677_v28 = vld [vmem:[#allocation2 + $0x210] ss:$8 sps:$4 sm:$0xff]   ;;  %1333 = vmatprep.subr.bf16.mxu1 %v3774_v27 }
  0x83   :  { %974 = vmatpush1.bf16.msra.mxu0 %v3606_v29  ;;  %v3682_v29 = vld [vmem:[#allocation2 + $0x224] ss:$8 sps:$4 sm:$0xff]  }
  0x84   :  { %975 = vmatprep.subr.bf16.mxu0 %v3607_v30  ;;  %v3776_v30 = vld [vmem:[#allocation5 + $0x10] ss:$8 sps:$4 sm:$0xff]  }
  0x85   :  { %1334 = vmatpush1.bf16.msra.mxu1 %v3776_v30  ;;  %v3728_v30 = vld [vmem:[#allocation2 + $0x320] ss:$8 sps:$4 sm:$0xff]  }
  0x87   :  { %976 = vmatpush1.bf16.msra.mxu0 %v3609_v31  ;;  %v3777_v31 = vld [vmem:[#allocation5 + $0x24] ss:$8 sps:$4 sm:$0xff]  }
  0x88   :  { %977 = vmatprep.subr.bf16.mxu0 %v3610_v32  ;;  %v3680_v32 = vld [vmem:[#allocation2 + $0x220] ss:$8 sps:$4 sm:$0xff]   ;;  %1335 = vmatprep.subr.bf16.mxu1 %v3777_v31  ;;  %v3733_v31 = vld [vmem:[#allocation2 + $0x334] ss:$8 sps:$4 sm:$0xff]  }
  0x8b   :  { %978 = vmatpush1.bf16.msra.mxu0 %v3612_v33  ;;  %v3685_v33 = vld [vmem:[#allocation2 + $0x234] ss:$8 sps:$4 sm:$0xff]  }
  0x8c   :  { %979 = vmatprep.subr.bf16.mxu0 %v3613_v34  ;;  %v3779_v34 = vld [vmem:[#allocation5 + $0x20] ss:$8 sps:$4 sm:$0xff]  }
  0x8d   :  { %1336 = vmatpush1.bf16.msra.mxu1 %v3779_v34  ;;  %v3739_v34 = vld [vmem:[#allocation2 + $0x354] ss:$8 sps:$4 sm:$0xff]  }
  0x8f   :  { %980 = vmatpush1.bf16.msra.mxu0 %v3615_v35  ;;  %v3780_v35 = vld [vmem:[#allocation5 + $0x34] ss:$8 sps:$4 sm:$0xff]  }
  0x90   :  { %981 = vmatprep.subr.bf16.mxu0 %v3616_v36  ;;  %v3683_v36 = vld [vmem:[#allocation2 + $0x230] ss:$8 sps:$4 sm:$0xff]   ;;  %1337 = vmatprep.subr.bf16.mxu1 %v3780_v35 }
  0x91   :  { %1338 = vmatpush1.bf16.msra.mxu1 %v3782_v38  ;;  %v3737_v35 = vld [vmem:[#allocation2 + $0x350] ss:$8 sps:$4 sm:$0xff]   ;;  %v3745_v38 = vld [vmem:[#allocation2 + $0x374] ss:$8 sps:$4 sm:$0xff]  }
  0x93   :  { %982 = vmatpush1.bf16.msra.mxu0 %v3618_v37  ;;  %v3688_v37 = vld [vmem:[#allocation2 + $0x244] ss:$8 sps:$4 sm:$0xff]  }
  0x94   :  { %983 = vmatprep.subr.bf16.mxu0 %v3619_v39  ;;  %v3783_v39 = vld [vmem:[#allocation5 + $0x44] ss:$8 sps:$4 sm:$0xff]  }
  0x95   :  { %1339 = vmatprep.subr.bf16.mxu1 %v3783_v39  ;;  %v3743_v39 = vld [vmem:[#allocation2 + $0x370] ss:$8 sps:$4 sm:$0xff]  }
  0x97   :  { %984 = vmatpush1.bf16.msra.mxu0 %v3621_v40  ;;  %v3686_v40 = vld [vmem:[#allocation2 + $0x240] ss:$8 sps:$4 sm:$0xff]  }
  0x98   :  { %985 = vmatprep.subr.bf16.mxu0 %v3622_v42  ;;  %v3785_v42 = vld [vmem:[#allocation5 + $0x40] ss:$8 sps:$4 sm:$0xff]  }
  0x99   :  { %1340 = vmatpush1.bf16.msra.mxu1 %v3785_v42  ;;  %v3751_v42 = vld [vmem:[#allocation2 + $0x394] ss:$8 sps:$4 sm:$0xff]  }
  0x9b   :  { %986 = vmatpush1.bf16.msra.mxu0 %v3624_v43  ;;  %v3786_v43 = vld [vmem:[#allocation5 + $0x54] ss:$8 sps:$4 sm:$0xff]  }
  0x9c   :  { %996 = vmatprep.subr.bf16.mxu0 %v3628_v45  ;;  %v3694_v45 = vld [vmem:[#allocation2 + $0x264] ss:$8 sps:$4 sm:$0xff]   ;;  %1341 = vmatprep.subr.bf16.mxu1 %v3786_v43  ;;  %v3749_v43 = vld [vmem:[#allocation2 + $0x390] ss:$8 sps:$4 sm:$0xff]  }
  0x9e   :  { %988 = vmatmul.mubr.bf16.vlgmr.msra.gmra.mrb[0].mxu0 %v167_v46  ;;  %v3788_v46 = vld [vmem:[#allocation5 + $0x50] ss:$8 sps:$4 sm:$0xff]  }
  0x9f   :  { %997 = vmatpush1.bf16.msra.mxu0 %v3626_v47  ;;  %1028 = vmatprep.mubr.bf16.mxu0 %v170_v48  ;;  %v3789_v47 = vld [vmem:[#allocation5 + $0x64] ss:$8 sps:$4 sm:$0xff]   ;;  %v3692_v48 = vld [vmem:[#allocation2 + $0x260] ss:$8 sps:$4 sm:$0xff]  }
  0xa0   :  { %998 = vmatprep.subr.bf16.mxu0 %v3631_v49  ;;  %v3697_v49 = vld [vmem:[#allocation2 + $0x274] ss:$8 sps:$4 sm:$0xff]   ;;  %1342 = vmatpush1.bf16.msra.mxu1 %v3788_v46 }
  0xa1   :  { %1343 = vmatprep.subr.bf16.mxu1 %v3789_v47  ;;  %v3757_v46 = vld [vmem:[#allocation2 + $0x3b4] ss:$8 sps:$4 sm:$0xff]   ;;  %v3755_v47 = vld [vmem:[#allocation2 + $0x3b0] ss:$8 sps:$4 sm:$0xff]  }
  0xa3   :  { %999 = vmatpush1.bf16.msra.mxu0 %v3629_v50  ;;  %v3791_v50 = vld [vmem:[#allocation5 + $0x60] ss:$8 sps:$4 sm:$0xff]  }
  0xa4   :  { %1000 = vmatprep.subr.bf16.mxu0 %v3634_v51  ;;  %v3792_v51 = vld [vmem:[#allocation5 + $0x74] ss:$8 sps:$4 sm:$0xff]   ;;  %1344 = vmatpush1.bf16.msra.mxu1 %v3791_v50 }
  0xa5   :  { %1345 = vmatprep.subr.bf16.mxu1 %v3792_v51  ;;  %v3763_v50 = vld [vmem:[#allocation2 + $0x3d4] ss:$8 sps:$4 sm:$0xff]   ;;  %v3761_v51 = vld [vmem:[#allocation2 + $0x3d0] ss:$8 sps:$4 sm:$0xff]  }
  0xa7   :  { %1001 = vmatpush1.bf16.msra.mxu0 %v3632_v52  ;;  %v3695_v52 = vld [vmem:[#allocation2 + $0x270] ss:$8 sps:$4 sm:$0xff]  }
  0xa8   :  { %1002 = vmatprep.subr.bf16.mxu0 %v3637_v53  ;;  %v3700_v53 = vld [vmem:[#allocation2 + $0x284] ss:$8 sps:$4 sm:$0xff]  }
  0xab   :  { %1003 = vmatpush1.bf16.msra.mxu0 %v3635_v54  ;;  %v3794_v54 = vld [vmem:[#allocation5 + $0x70] ss:$8 sps:$4 sm:$0xff]  }
  0xac   :  { %1004 = vmatprep.subr.bf16.mxu0 %v3640_v55  ;;  %v3795_v55 = vld [vmem:[#allocation5 + $0x84] ss:$8 sps:$4 sm:$0xff]   ;;  %1346 = vmatpush1.bf16.msra.mxu1 %v3794_v54  ;;  %v3769_v54 = vld [vmem:[#allocation2 + $0x3f4] ss:$8 sps:$4 sm:$0xff]  }
  0xad   :  { %1347 = vmatprep.subr.bf16.mxu1 %v3795_v55  ;;  %v3767_v55 = vld [vmem:[#allocation2 + $0x3f0] ss:$8 sps:$4 sm:$0xff]  }
  0xaf   :  { %1005 = vmatpush1.bf16.msra.mxu0 %v3638_v56  ;;  %v3698_v56 = vld [vmem:[#allocation2 + $0x280] ss:$8 sps:$4 sm:$0xff]  }
  0xb0   :  { %1006 = vmatprep.subr.bf16.mxu0 %v3643_v57  ;;  %v3703_v57 = vld [vmem:[#allocation2 + $0x294] ss:$8 sps:$4 sm:$0xff]  }
  0xb3   :  { %1007 = vmatpush1.bf16.msra.mxu0 %v3641_v58  ;;  %v3797_v58 = vld [vmem:[#allocation5 + $0x80] ss:$8 sps:$4 sm:$0xff]  }
  0xb4   :  { %1008 = vmatprep.subr.bf16.mxu0 %v3646_v59  ;;  %v3798_v59 = vld [vmem:[#allocation5 + $0x94] ss:$8 sps:$4 sm:$0xff]   ;;  %1348 = vmatpush1.bf16.msra.mxu1 %v3797_v58  ;;  %v3815_v58 = vld [vmem:[#allocation5 + $0xe0] ss:$8 sps:$4 sm:$0xff]  }
  0xb5   :  { %1349 = vmatprep.subr.bf16.mxu1 %v3798_v59  ;;  %v3816_v59 = vld [vmem:[#allocation5 + $0xf4] ss:$8 sps:$4 sm:$0xff]  }
  0xb7   :  { %1009 = vmatpush1.bf16.msra.mxu0 %v3644_v60  ;;  %v3701_v60 = vld [vmem:[#allocation2 + $0x290] ss:$8 sps:$4 sm:$0xff]  }
  0xb8   :  { %1010 = vmatprep.subr.bf16.mxu0 %v3649_v61  ;;  %v3706_v61 = vld [vmem:[#allocation2 + $0x2a4] ss:$8 sps:$4 sm:$0xff]  }
  0xbb   :  { %1011 = vmatpush1.bf16.msra.mxu0 %v3647_v62  ;;  %v3800_v62 = vld [vmem:[#allocation5 + $0x90] ss:$8 sps:$4 sm:$0xff]  }
  0xbc   :  { %1012 = vmatprep.subr.bf16.mxu0 %v3652_v63  ;;  %v3801_v63 = vld [vmem:[#allocation5 + $0xa4] ss:$8 sps:$4 sm:$0xff]   ;;  %1350 = vmatpush1.bf16.msra.mxu1 %v3800_v62  ;;  %v4361_v62 = vsub.s32 0, %v4322_v13 }
  0xbd   :  { %1351 = vmatprep.subr.bf16.mxu1 %v3801_v63  ;;  %v303_v63 = vld [vmem:[%s4525_s3] sm:$0x3] }
  0xbf   :  { %1013 = vmatpush1.bf16.msra.mxu0 %v3650_v0  ;;  %v3704_v0 = vld [vmem:[#allocation2 + $0x2a0] ss:$8 sps:$4 sm:$0xff]  }
  0xc0   :  { %1014 = vmatprep.subr.bf16.mxu0 %v3655_v1  ;;  %v3709_v1 = vld [vmem:[#allocation2 + $0x2b4] ss:$8 sps:$4 sm:$0xff]  }
  0xc3   :  { %1015 = vmatpush1.bf16.msra.mxu0 %v3653_v2  ;;  %v3803_v2 = vld [vmem:[#allocation5 + $0xa0] ss:$8 sps:$4 sm:$0xff]  }
  0xc4   :  { %1016 = vmatprep.subr.bf16.mxu0 %v3658_v3  ;;  %v3804_v3 = vld [vmem:[#allocation5 + $0xb4] ss:$8 sps:$4 sm:$0xff]   ;;  %1352 = vmatpush1.bf16.msra.mxu1 %v3803_v2 }
  0xc5   :  { %1353 = vmatprep.subr.bf16.mxu1 %v3804_v3 }
  0xc7   :  { %1017 = vmatpush1.bf16.msra.mxu0 %v3656_v4  ;;  %v3707_v4 = vld [vmem:[#allocation2 + $0x2b0] ss:$8 sps:$4 sm:$0xff]  }
  0xc8   :  { %1018 = vmatprep.subr.bf16.mxu0 %v3661_v5  ;;  %v3712_v5 = vld [vmem:[#allocation2 + $0x2c4] ss:$8 sps:$4 sm:$0xff]  }
  0xcb   :  { %1019 = vmatpush1.bf16.msra.mxu0 %v3659_v6  ;;  %v3806_v6 = vld [vmem:[#allocation5 + $0xb0] ss:$8 sps:$4 sm:$0xff]  }
  0xcc   :  { %1020 = vmatprep.subr.bf16.mxu0 %v3664_v7  ;;  %v3807_v7 = vld [vmem:[#allocation5 + $0xc4] ss:$8 sps:$4 sm:$0xff]   ;;  %1354 = vmatpush1.bf16.msra.mxu1 %v3806_v6 }
  0xcd   :  { %1355 = vmatprep.subr.bf16.mxu1 %v3807_v7 }
  0xcf   :  { %1021 = vmatpush1.bf16.msra.mxu0 %v3662_v8  ;;  %v3710_v8 = vld [vmem:[#allocation2 + $0x2c0] ss:$8 sps:$4 sm:$0xff]  }
  0xd0   :  { %1022 = vmatprep.subr.bf16.mxu0 %v3667_v9  ;;  %v3715_v9 = vld [vmem:[#allocation2 + $0x2d4] ss:$8 sps:$4 sm:$0xff]  }
  0xd3   :  { %1023 = vmatpush1.bf16.msra.mxu0 %v3665_v10  ;;  %v3809_v10 = vld [vmem:[#allocation5 + $0xc0] ss:$8 sps:$4 sm:$0xff]  }
  0xd4   :  { %1024 = vmatprep.subr.bf16.mxu0 %v3670_v11  ;;  %v3810_v11 = vld [vmem:[#allocation5 + $0xd4] ss:$8 sps:$4 sm:$0xff]   ;;  %1356 = vmatpush1.bf16.msra.mxu1 %v3809_v10 }
  0xd5   :  { %1357 = vmatprep.subr.bf16.mxu1 %v3810_v11 }
  0xd7   :  { %1025 = vmatpush1.bf16.msra.mxu0 %v3668_v14  ;;  %v3713_v14 = vld [vmem:[#allocation2 + $0x2d0] ss:$8 sps:$4 sm:$0xff]  }
  0xd8   :  { %1026 = vmatprep.subr.bf16.mxu0 %v3673_v15  ;;  %v142_v15 = vcombine.high %v4339_v12, %v4339_v12  ;;  %1358 = vmatpush1.bf16.msra.mxu1 %v3812_v19  ;;  %v3724_v12 = vld [vmem:[#allocation2 + $0x304] ss:$8 sps:$4 sm:$0xff]  }
  0xdb   :  { %1027 = vmatpush1.bf16.msra.mxu0 %v3671_v18  ;;  %v3718_v18 = vld [vmem:[#allocation2 + $0x2e4] ss:$8 sps:$4 sm:$0xff]  }
  0xdc   :  { %1037 = vmatprep.subr.bf16.mxu0 %v3676_v20  ;;  %v3716_v20 = vld [vmem:[#allocation2 + $0x2e0] ss:$8 sps:$4 sm:$0xff]  }
  0xde   :  { %1029 = vmatmul.mubr.bf16.vlgmr.msra.gmra.mrb[0].mxu0 %v169_v21  ;;  %v4352_v21 = vrot.slane %v142_v15, %v4325_v16  ;;  %v3725_v16 = vld [vmem:[#allocation2 + $0x310] ss:$8 sps:$4 sm:$0xff]  }
  0xdf   :  { %1038 = vmatpush1.bf16.msra.mxu0 %v3674_v22  ;;  %1069 = vmatprep.mubr.bf16.mxu0 %v172_v23  ;;  %v3721_v22 = vld [vmem:[#allocation2 + $0x2f4] ss:$8 sps:$4 sm:$0xff]   ;;  %v3719_v23 = vld [vmem:[#allocation2 + $0x2f0] ss:$8 sps:$4 sm:$0xff]  }
  0xe0   :  { %1039 = vmatprep.subr.bf16.mxu0 %v3679_v24  ;;  %v158_v24 = vcombine.high %v4352_v21, %v4352_v21 }
  0xe2   :  { %v174_v27 = vpack.c.bf16 %v158_v24, %v158_v24  ;;  %v3830_v24 = vld [vmem:[#allocation7 + $0x34] ss:$8 sps:$4 sm:$0xff]  }
  0xe3   :  { %1040 = vmatpush1.bf16.msra.mxu0 %v3677_v28  ;;  %v3727_v28 = vld [vmem:[#allocation2 + $0x314] ss:$8 sps:$4 sm:$0xff]  }
  0xe4   :  { %1041 = vmatprep.subr.bf16.mxu0 %v3682_v29  ;;  %v3730_v29 = vld [vmem:[#allocation2 + $0x324] ss:$8 sps:$4 sm:$0xff]  }
  0xe7   :  { %1042 = vmatpush1.bf16.msra.mxu0 %v3680_v32  ;;  %v3731_v32 = vld [vmem:[#allocation2 + $0x330] ss:$8 sps:$4 sm:$0xff]  }
  0xe8   :  { %1043 = vmatprep.subr.bf16.mxu0 %v3685_v33  ;;  %v3736_v33 = vld [vmem:[#allocation2 + $0x344] ss:$8 sps:$4 sm:$0xff]  }
  0xeb   :  { %1044 = vmatpush1.bf16.msra.mxu0 %v3683_v36  ;;  %v3742_v36 = vld [vmem:[#allocation2 + $0x364] ss:$8 sps:$4 sm:$0xff]  }
  0xec   :  { %1045 = vmatprep.subr.bf16.mxu0 %v3688_v37  ;;  %v3740_v37 = vld [vmem:[#allocation2 + $0x360] ss:$8 sps:$4 sm:$0xff]  }
  0xef   :  { %1046 = vmatpush1.bf16.msra.mxu0 %v3686_v40  ;;  %v3748_v40 = vld [vmem:[#allocation2 + $0x384] ss:$8 sps:$4 sm:$0xff]  }
  0xf0   :  { %1047 = vmatprep.subr.bf16.mxu0 %v3691_v41  ;;  %v3746_v41 = vld [vmem:[#allocation2 + $0x380] ss:$8 sps:$4 sm:$0xff]  }
  0xf3   :  { %1048 = vmatpush1.bf16.msra.mxu0 %v3689_v44  ;;  %v3754_v44 = vld [vmem:[#allocation2 + $0x3a4] ss:$8 sps:$4 sm:$0xff]  }
  0xf4   :  { %1049 = vmatprep.subr.bf16.mxu0 %v3694_v45  ;;  %v3752_v45 = vld [vmem:[#allocation2 + $0x3a0] ss:$8 sps:$4 sm:$0xff]  }
  0xf7   :  { %1050 = vmatpush1.bf16.msra.mxu0 %v3692_v48  ;;  %v3760_v48 = vld [vmem:[#allocation2 + $0x3c4] ss:$8 sps:$4 sm:$0xff]  }
  0xf8   :  { %1051 = vmatprep.subr.bf16.mxu0 %v3697_v49  ;;  %v3758_v49 = vld [vmem:[#allocation2 + $0x3c0] ss:$8 sps:$4 sm:$0xff]  }
  0xfb   :  { %1052 = vmatpush1.bf16.msra.mxu0 %v3695_v52  ;;  %v3766_v52 = vld [vmem:[#allocation2 + $0x3e4] ss:$8 sps:$4 sm:$0xff]  }
  0xfc   :  { %1053 = vmatprep.subr.bf16.mxu0 %v3700_v53  ;;  %v3764_v53 = vld [vmem:[#allocation2 + $0x3e0] ss:$8 sps:$4 sm:$0xff]  }
  0xff   :  { %1054 = vmatpush1.bf16.msra.mxu0 %v3698_v56  ;;  %v173_v56 = vpack.c.bf16 %v4352_v21, %v4352_v21  ;;  %v3822_v21 = vld [vmem:[#allocation7 + $0x10] ss:$8 sps:$4 sm:$0xff]  }
 0x100   :  { %1055 = vmatprep.subr.bf16.mxu0 %v3703_v57  ;;  %v3813_v57 = vld [vmem:[#allocation5 + $0xe4] ss:$8 sps:$4 sm:$0xff]  }
 0x101   :  { %1359 = vmatprep.subr.bf16.mxu1 %v3813_v57 }
 0x102   :  { %1360 = vmatpush1.bf16.msra.mxu1 %v3815_v58 }
 0x103   :  { %1056 = vmatpush1.bf16.msra.mxu0 %v3701_v60  ;;  %v3818_v60 = vld [vmem:[#allocation5 + $0xf0] ss:$8 sps:$4 sm:$0xff]   ;;  %1361 = vmatprep.subr.bf16.mxu1 %v3816_v59 }
 0x104   :  { %1057 = vmatprep.subr.bf16.mxu0 %v3706_v61  ;;  %v3821_v61 = vld [vmem:[#allocation7 + $0x4] ss:$8 sps:$4 sm:$0xff]  }
 0x106   :  { %1362 = vmatpush1.bf16.msra.mxu1 %v3818_v60 }
 0x107   :  { %1058 = vmatpush1.bf16.msra.mxu0 %v3704_v0  ;;  %1584 = vmatprep.subr.bf16.mxu1 %v3821_v61  ;;  %v4367_v0 = vsub.s32 1, %v4322_v13 }
 0x108   :  { %1059 = vmatprep.subr.bf16.mxu0 %v3709_v1  ;;  %v308_v1 = vrot.slane %v303_v63, %v4361_v62 }
 0x109   :  { %v312_v2 = vrot.slane %v303_v63, %v4367_v0  ;;  %v3867_v63 = vld [vmem:[%s4530_s8] ss:$8 sps:$4 sm:$0xff]  }
 0x10b   :  { %1060 = vmatpush1.bf16.msra.mxu0 %v3707_v4 }
 0x10c   :  { %1061 = vmatprep.subr.bf16.mxu0 %v3712_v5 }
 0x10f   :  { %1062 = vmatpush1.bf16.msra.mxu0 %v3710_v8 }
 0x110   :  { %1063 = vmatprep.subr.bf16.mxu0 %v3715_v9 }
 0x113   :  { %1064 = vmatpush1.bf16.msra.mxu0 %v3713_v14 }
 0x114   :  { %1065 = vmatprep.subr.bf16.mxu0 %v3718_v18  ;;  %v3819_v18 = vld [vmem:[#allocation7] ss:$8 sps:$4 sm:$0xff]  }
 0x117   :  { %1066 = vmatpush1.bf16.msra.mxu0 %v3716_v20  ;;  %v3824_v20 = vld [vmem:[#allocation7 + $0x14] ss:$8 sps:$4 sm:$0xff]  }
 0x118   :  { %1067 = vmatprep.subr.bf16.mxu0 %v3721_v22  ;;  %v3827_v22 = vld [vmem:[#allocation7 + $0x24] ss:$8 sps:$4 sm:$0xff]  }
 0x11b   :  { %1068 = vmatpush1.bf16.msra.mxu0 %v3719_v23  ;;  %v3825_v23 = vld [vmem:[#allocation7 + $0x20] ss:$8 sps:$4 sm:$0xff]  }
 0x11c   :  { %1078 = vmatprep.subr.bf16.mxu0 %v3724_v12  ;;  %v3828_v12 = vld [vmem:[#allocation7 + $0x30] ss:$8 sps:$4 sm:$0xff]  }
 0x11e   :  { %1070 = vmatmul.mubr.bf16.vlgmr.msra.gmra.mrb[0].mxu0 %v171_v25  ;;  %v3833_v25 = vld [vmem:[#allocation7 + $0x44] ss:$8 sps:$4 sm:$0xff]  }
 0x11f   :  { %1079 = vmatpush1.bf16.msra.mxu0 %v3722_v26  ;;  %1110 = vmatprep.mubr.bf16.mxu0 %v174_v27  ;;  %v3831_v26 = vld [vmem:[#allocation7 + $0x40] ss:$8 sps:$4 sm:$0xff]   ;;  %v3836_v27 = vld [vmem:[#allocation7 + $0x54] ss:$8 sps:$4 sm:$0xff]  }
 0x120   :  { %1080 = vmatprep.subr.bf16.mxu0 %v3727_v28  ;;  %v3834_v28 = vld [vmem:[#allocation7 + $0x50] ss:$8 sps:$4 sm:$0xff]  }
 0x123   :  { %1081 = vmatpush1.bf16.msra.mxu0 %v3725_v16  ;;  %v3839_v16 = vld [vmem:[#allocation7 + $0x64] ss:$8 sps:$4 sm:$0xff]  }
 0x124   :  { %1082 = vmatprep.subr.bf16.mxu0 %v3730_v29  ;;  %v3837_v29 = vld [vmem:[#allocation7 + $0x60] ss:$8 sps:$4 sm:$0xff]  }
 0x127   :  { %1083 = vmatpush1.bf16.msra.mxu0 %v3728_v30  ;;  %v3842_v30 = vld [vmem:[#allocation7 + $0x74] ss:$8 sps:$4 sm:$0xff]  }
 0x128   :  { %1084 = vmatprep.subr.bf16.mxu0 %v3733_v31  ;;  %v3840_v31 = vld [vmem:[#allocation7 + $0x70] ss:$8 sps:$4 sm:$0xff]  }
 0x12b   :  { %1085 = vmatpush1.bf16.msra.mxu0 %v3731_v32  ;;  %v3845_v32 = vld [vmem:[#allocation7 + $0x84] ss:$8 sps:$4 sm:$0xff]  }
 0x12c   :  { %1086 = vmatprep.subr.bf16.mxu0 %v3736_v33  ;;  %v3843_v33 = vld [vmem:[#allocation7 + $0x80] ss:$8 sps:$4 sm:$0xff]  }
 0x12f   :  { %1087 = vmatpush1.bf16.msra.mxu0 %v3734_v17  ;;  %v3848_v17 = vld [vmem:[#allocation7 + $0x94] ss:$8 sps:$4 sm:$0xff]  }
 0x130   :  { %1088 = vmatprep.subr.bf16.mxu0 %v3739_v34  ;;  %v3846_v34 = vld [vmem:[#allocation7 + $0x90] ss:$8 sps:$4 sm:$0xff]  }
 0x133   :  { %1089 = vmatpush1.bf16.msra.mxu0 %v3737_v35  ;;  %v3851_v35 = vld [vmem:[#allocation7 + $0xa4] ss:$8 sps:$4 sm:$0xff]  }
 0x134   :  { %1090 = vmatprep.subr.bf16.mxu0 %v3742_v36  ;;  %v3849_v36 = vld [vmem:[#allocation7 + $0xa0] ss:$8 sps:$4 sm:$0xff]  }
 0x137   :  { %1091 = vmatpush1.bf16.msra.mxu0 %v3740_v37  ;;  %v3854_v37 = vld [vmem:[#allocation7 + $0xb4] ss:$8 sps:$4 sm:$0xff]  }
 0x138   :  { %1092 = vmatprep.subr.bf16.mxu0 %v3745_v38  ;;  %v3852_v38 = vld [vmem:[#allocation7 + $0xb0] ss:$8 sps:$4 sm:$0xff]  }
 0x13b   :  { %1093 = vmatpush1.bf16.msra.mxu0 %v3743_v39  ;;  %v3857_v39 = vld [vmem:[#allocation7 + $0xc4] ss:$8 sps:$4 sm:$0xff]  }
 0x13c   :  { %1094 = vmatprep.subr.bf16.mxu0 %v3748_v40  ;;  %v3855_v40 = vld [vmem:[#allocation7 + $0xc0] ss:$8 sps:$4 sm:$0xff]  }
 0x13f   :  { %1095 = vmatpush1.bf16.msra.mxu0 %v3746_v41  ;;  %v3860_v41 = vld [vmem:[#allocation7 + $0xd4] ss:$8 sps:$4 sm:$0xff]  }
 0x140   :  { %1096 = vmatprep.subr.bf16.mxu0 %v3751_v42  ;;  %v3858_v42 = vld [vmem:[#allocation7 + $0xd0] ss:$8 sps:$4 sm:$0xff]  }
 0x143   :  { %1097 = vmatpush1.bf16.msra.mxu0 %v3749_v43  ;;  %v3863_v43 = vld [vmem:[#allocation7 + $0xe4] ss:$8 sps:$4 sm:$0xff]  }
 0x144   :  { %1098 = vmatprep.subr.bf16.mxu0 %v3754_v44  ;;  %v3861_v44 = vld [vmem:[#allocation7 + $0xe0] ss:$8 sps:$4 sm:$0xff]  }
 0x147   :  { %1099 = vmatpush1.bf16.msra.mxu0 %v3752_v45  ;;  %v3866_v45 = vld [vmem:[#allocation7 + $0xf4] ss:$8 sps:$4 sm:$0xff]  }
 0x148   :  { %1100 = vmatprep.subr.bf16.mxu0 %v3757_v46  ;;  %v3864_v46 = vld [vmem:[#allocation7 + $0xf0] ss:$8 sps:$4 sm:$0xff]  }
 0x14b   :  { %1101 = vmatpush1.bf16.msra.mxu0 %v3755_v47  ;;  %v3869_v47 = vld [vmem:[%s4530_s8 + $0x4] ss:$8 sps:$4 sm:$0xff]  }
 0x14c   :  { %1102 = vmatprep.subr.bf16.mxu0 %v3760_v48  ;;  %v1159_v48 = vld [vmem:[%s4527_s5] sm:$0x3] }
 0x14f   :  { %1103 = vmatpush1.bf16.msra.mxu0 %v3758_v49  ;;  %v1164_v49 = vrot.slane %v1159_v48, %v4361_v62 }
 0x150   :  { %1104 = vmatprep.subr.bf16.mxu0 %v3763_v50  ;;  %v1168_v50 = vrot.slane %v1159_v48, %v4367_v0  ;;  %v3909_v48 = vld [vmem:[#allocation8 + $0x60] ss:$8 sps:$4 sm:$0xff]  }
 0x153   :  { %1105 = vmatpush1.bf16.msra.mxu0 %v3761_v51 }
 0x154   :  { %1106 = vmatprep.subr.bf16.mxu0 %v3766_v52 }
 0x157   :  { %1107 = vmatpush1.bf16.msra.mxu0 %v3764_v53 }
 0x158   :  { %1108 = vmatprep.subr.bf16.mxu0 %v3769_v54 }
 0x15b   :  { %1109 = vmatpush1.bf16.msra.mxu0 %v3767_v55 }
 0x15e   :  { %1111 = vmatmul.mubr.bf16.vlgmr.msra.gmra.mrb[0].mxu0 %v173_v56 }
 0x231   :  { %v1112_v3 = vpop.f32.mrb[0].mxu0 }
 0x232   :  { %v3549_v4 = vadd.f32 %v1112_v3, %v308_v1  ;;  %v1114_v5 = vpop.f32.mrb[1].mxu0  ;;  %v3870_v3 = vld [vmem:[%s4530_s8 + $0x10] ss:$8 sps:$4 sm:$0xff]  }
 0x233   :  { %v3550_v6 = vadd.f32 %v1114_v5, %v312_v2  ;;  %v1116_v7 = vpop.f32.mrb[2].mxu0  ;;  %v3872_v2 = vld [vmem:[%s4530_s8 + $0x14] ss:$8 sps:$4 sm:$0xff]   ;;  %v3873_v5 = vld [vmem:[%s4530_s8 + $0x20] ss:$8 sps:$4 sm:$0xff]  }
 0x234   :  { %vm1119_vm0 = vcmp.ge.f32.partialorder %v3549_v4, 0.0  ;;  %v1121_v8 = vmul.f32 0.2, %v3549_v4  ;;  %v1117_v9 = vpop.f32.mrb[3].mxu0  ;;  %v3876_v7 = vld [vmem:[%s4530_s8 + $0x30] ss:$8 sps:$4 sm:$0xff]  }
 0x235   :  { %vm1120_vm1 = vcmp.ge.f32.partialorder %v3550_v6, 0.0  ;;  %v1122_v10 = vmul.f32 0.2, %v3550_v6  ;;  %v3879_v9 = vld [vmem:[%s4530_s8 + $0x40] ss:$8 sps:$4 sm:$0xff]  }
 0x236   :  { %v1123_v11 = vsel %vm1119_vm0, %v3549_v4, %v1121_v8  ;;  %v3875_v4 = vld [vmem:[%s4530_s8 + $0x24] ss:$8 sps:$4 sm:$0xff]  }
 0x237   :  { %v1124_v14 = vsel %vm1120_vm1, %v3550_v6, %v1122_v10  ;;  %v1125_v19 = vpack.c.bf16 %v1123_v11, %v1123_v11  ;;  %v3878_v6 = vld [vmem:[%s4530_s8 + $0x34] ss:$8 sps:$4 sm:$0xff]   ;;  %v3881_v8 = vld [vmem:[%s4530_s8 + $0x44] ss:$8 sps:$4 sm:$0xff]   ;;  %v3882_v11 = vld [vmem:[%s4530_s8 + $0x50] ss:$8 sps:$4 sm:$0xff]  }
 0x238   :  { %v1126_v15 = vpack.c.bf16 %v1124_v14, %v1124_v14  ;;  %v3884_v10 = vld [vmem:[%s4530_s8 + $0x54] ss:$8 sps:$4 sm:$0xff]   ;;  %v3887_v14 = vld [vmem:[%s4530_s8 + $0x64] ss:$8 sps:$4 sm:$0xff]  }
 0x23a   :  { %1363 = vmatprep.mubr.bf16.mxu1 %v1126_v15  ;;  %v4147_v15 = vmov 0  }
 0x23b   :  { %1364 = vmatmul.mubr.bf16.vlgmr.msra.gmra.mrb[0].mxu1 %v1125_v19  ;;  %v3890_v19 = vld [vmem:[%s4530_s8 + $0x74] ss:$8 sps:$4 sm:$0xff]  }
 0x23c   :  { %1585 = vmatpush1.bf16.msra.mxu1 %v3819_v18  ;;  %v3885_v18 = vld [vmem:[%s4530_s8 + $0x60] ss:$8 sps:$4 sm:$0xff]  }
 0x23d   :  { %1586 = vmatprep.subr.bf16.mxu1 %v3824_v20  ;;  %v3888_v20 = vld [vmem:[%s4530_s8 + $0x70] ss:$8 sps:$4 sm:$0xff]  }
 0x240   :  { %1587 = vmatpush1.bf16.msra.mxu1 %v3822_v21  ;;  %v3893_v21 = vld [vmem:[#allocation8 + $0x4] ss:$8 sps:$4 sm:$0xff]  }
 0x241   :  { %1588 = vmatprep.subr.bf16.mxu1 %v3827_v22  ;;  %v1412_v22 = vld [vmem:[%s4529_s7] sm:$0x3] }
 0x244   :  { %1589 = vmatpush1.bf16.msra.mxu1 %v3825_v23  ;;  %v1417_v23 = vrot.slane %v1412_v22, %v4361_v62 }
 0x245   :  { %1590 = vmatprep.subr.bf16.mxu1 %v3830_v24  ;;  %v1421_v24 = vrot.slane %v1412_v22, %v4367_v0  ;;  %v2064_v22 = vld [vmem:[#allocation10 + $0xa8] sm:$0xff] }
 0x248   :  { %1591 = vmatpush1.bf16.msra.mxu1 %v3828_v12 }
 0x249   :  { %1592 = vmatprep.subr.bf16.mxu1 %v3833_v25 }
 0x24c   :  { %1593 = vmatpush1.bf16.msra.mxu1 %v3831_v26 }
 0x24d   :  { %1594 = vmatprep.subr.bf16.mxu1 %v3836_v27 }
 0x250   :  { %1595 = vmatpush1.bf16.msra.mxu1 %v3834_v28 }
 0x251   :  { %1596 = vmatprep.subr.bf16.mxu1 %v3839_v16 }
 0x254   :  { %1597 = vmatpush1.bf16.msra.mxu1 %v3837_v29 }
 0x255   :  { %1598 = vmatprep.subr.bf16.mxu1 %v3842_v30 }
 0x258   :  { %1599 = vmatpush1.bf16.msra.mxu1 %v3840_v31  ;;  %v1628_v31 = vld [vmem:[%s4523_s1] sm:$0x1] }
 0x259   :  { %1600 = vmatprep.subr.bf16.mxu1 %v3845_v32  ;;  %v1629_v32 = vunpack.c.l.bf16 %v1628_v31  ;;  %v2084_v31 = vld [vmem:[#allocation10 + $0x148] sm:$0xff] }
 0x25c   :  { %1601 = vmatpush1.bf16.msra.mxu1 %v3843_v33 }
 0x25d   :  { %1602 = vmatprep.subr.bf16.mxu1 %v3848_v17 }
 0x260   :  { %1603 = vmatpush1.bf16.msra.mxu1 %v3846_v34 }
 0x261   :  { %1604 = vmatprep.subr.bf16.mxu1 %v3851_v35  ;;  %v3891_v35 = vld [vmem:[#allocation8] ss:$8 sps:$4 sm:$0xff]  }
 0x264   :  { %1605 = vmatpush1.bf16.msra.mxu1 %v3849_v36 }
 0x265   :  { %1606 = vmatprep.subr.bf16.mxu1 %v3854_v37  ;;  %v3896_v37 = vld [vmem:[#allocation8 + $0x14] ss:$8 sps:$4 sm:$0xff]  }
 0x268   :  { %1607 = vmatpush1.bf16.msra.mxu1 %v3852_v38  ;;  %v3894_v38 = vld [vmem:[#allocation8 + $0x10] ss:$8 sps:$4 sm:$0xff]  }
 0x269   :  { %1608 = vmatprep.subr.bf16.mxu1 %v3857_v39  ;;  %v3899_v39 = vld [vmem:[#allocation8 + $0x24] ss:$8 sps:$4 sm:$0xff]  }
 0x26c   :  { %1609 = vmatpush1.bf16.msra.mxu1 %v3855_v40  ;;  %v3897_v40 = vld [vmem:[#allocation8 + $0x20] ss:$8 sps:$4 sm:$0xff]  }
 0x26d   :  { %1610 = vmatprep.subr.bf16.mxu1 %v3860_v41  ;;  %v3902_v41 = vld [vmem:[#allocation8 + $0x34] ss:$8 sps:$4 sm:$0xff]  }
 0x270   :  { %1611 = vmatpush1.bf16.msra.mxu1 %v3858_v42  ;;  %v3900_v42 = vld [vmem:[#allocation8 + $0x30] ss:$8 sps:$4 sm:$0xff]  }
 0x271   :  { %1612 = vmatprep.subr.bf16.mxu1 %v3863_v43  ;;  %v3905_v43 = vld [vmem:[#allocation8 + $0x44] ss:$8 sps:$4 sm:$0xff]  }
 0x274   :  { %1613 = vmatpush1.bf16.msra.mxu1 %v3861_v44  ;;  %v3903_v44 = vld [vmem:[#allocation8 + $0x40] ss:$8 sps:$4 sm:$0xff]  }
 0x275   :  { %1614 = vmatprep.subr.bf16.mxu1 %v3866_v45  ;;  %v3908_v45 = vld [vmem:[#allocation8 + $0x54] ss:$8 sps:$4 sm:$0xff]  }
 0x278   :  { %1615 = vmatpush1.bf16.msra.mxu1 %v3864_v46  ;;  %v3906_v46 = vld [vmem:[#allocation8 + $0x50] ss:$8 sps:$4 sm:$0xff]  }
 0x279   :  { %1741 = vmatprep.subr.bf16.mxu1 %v3869_v47  ;;  %v3911_v47 = vld [vmem:[#allocation8 + $0x64] ss:$8 sps:$4 sm:$0xff]  }
 0x30e   :  { %v1365_v51 = vpop.f32.mrb[0].mxu1 }
 0x30f   :  { %v1366_v52 = vadd.f32 %v1365_v51, %v1164_v49  ;;  %v1367_v53 = vpop.f32.mrb[1].mxu1  ;;  %v3914_v49 = vld [vmem:[#allocation8 + $0x74] ss:$8 sps:$4 sm:$0xff]   ;;  %v3917_v51 = vld [vmem:[#allocation8 + $0x84] ss:$8 sps:$4 sm:$0xff]  }
 0x310   :  { %v1368_v54 = vadd.f32 %v1367_v53, %v1168_v50  ;;  %v1369_v55 = vpop.f32.mrb[2].mxu1  ;;  %v3912_v50 = vld [vmem:[#allocation8 + $0x70] ss:$8 sps:$4 sm:$0xff]   ;;  %v3920_v53 = vld [vmem:[#allocation8 + $0x94] ss:$8 sps:$4 sm:$0xff]  }
 0x311   :  { %vm1372_vm2 = vcmp.ge.f32.partialorder %v1366_v52, 0.0  ;;  %v1374_v56 = vmul.f32 0.2, %v1366_v52  ;;  %v1370_v57 = vpop.f32.mrb[3].mxu1  ;;  %v3923_v55 = vld [vmem:[#allocation8 + $0xa4] ss:$8 sps:$4 sm:$0xff]  }
 0x312   :  { %vm1373_vm3 = vcmp.ge.f32.partialorder %v1368_v54, 0.0  ;;  %v1375_v58 = vmul.f32 0.2, %v1368_v54  ;;  %v3926_v57 = vld [vmem:[#allocation8 + $0xb4] ss:$8 sps:$4 sm:$0xff]  }
 0x313   :  { %v1376_v59 = vsel %vm1372_vm2, %v1366_v52, %v1374_v56  ;;  %v3915_v52 = vld [vmem:[#allocation8 + $0x80] ss:$8 sps:$4 sm:$0xff]  }
 0x314   :  { %v1377_v60 = vsel %vm1373_vm3, %v1368_v54, %v1375_v58  ;;  %v1378_v1 = vpack.c.bf16 %v1376_v59, %v1376_v59  ;;  %v3918_v54 = vld [vmem:[#allocation8 + $0x90] ss:$8 sps:$4 sm:$0xff]   ;;  %v3921_v56 = vld [vmem:[#allocation8 + $0xa0] ss:$8 sps:$4 sm:$0xff]   ;;  %v3929_v59 = vld [vmem:[#allocation8 + $0xc4] ss:$8 sps:$4 sm:$0xff]  }
 0x315   :  { %v1379_v61 = vpack.c.bf16 %v1377_v60, %v1377_v60  ;;  %v3924_v58 = vld [vmem:[#allocation8 + $0xb0] ss:$8 sps:$4 sm:$0xff]   ;;  %v3927_v60 = vld [vmem:[#allocation8 + $0xc0] ss:$8 sps:$4 sm:$0xff]  }
 0x317   :  { %1616 = vmatprep.mubr.bf16.mxu1 %v1379_v61  ;;  %v3932_v61 = vld [vmem:[#allocation8 + $0xd4] ss:$8 sps:$4 sm:$0xff]  }
 0x318   :  { %1617 = vmatmul.mubr.bf16.vlgmr.msra.gmra.mrb[4].mxu1 %v1378_v1  ;;  %v3935_v1 = vld [vmem:[#allocation8 + $0xe4] ss:$8 sps:$4 sm:$0xff]  }
 0x319   :  { %1742 = vmatpush1.bf16.msra.mxu1 %v3867_v63  ;;  %1773 = vmatprep.mubr.bf16.mxu1 %v4147_v15  ;;  %v3930_v63 = vld [vmem:[#allocation8 + $0xd0] ss:$8 sps:$4 sm:$0xff]   ;;  %v2052_v15 = vld [vmem:[#allocation10 + $0x48] sm:$0xff] }
 0x31a   :  { %1743 = vmatprep.subr.bf16.mxu1 %v3872_v2  ;;  %v3933_v2 = vld [vmem:[#allocation8 + $0xe0] ss:$8 sps:$4 sm:$0xff]  }
 0x31d   :  { %1744 = vmatpush1.bf16.msra.mxu1 %v3870_v3  ;;  %v3938_v3 = vld [vmem:[#allocation8 + $0xf4] ss:$8 sps:$4 sm:$0xff]  }
 0x31e   :  { %1745 = vmatprep.subr.bf16.mxu1 %v3875_v4  ;;  %v3936_v4 = vld [vmem:[#allocation8 + $0xf0] ss:$8 sps:$4 sm:$0xff]  }
 0x321   :  { %1746 = vmatpush1.bf16.msra.mxu1 %v3873_v5  ;;  %v4432_v5 = vld [vmem:[#allocation10] sm:$0xff] }
 0x322   :  { %1747 = vmatprep.subr.bf16.mxu1 %v3878_v6  ;;  %v4434_v6 = vld [vmem:[#allocation10 + $0x20] sm:$0xff] }
 0x325   :  { %1748 = vmatpush1.bf16.msra.mxu1 %v3876_v7  ;;  %v2044_v7 = vld [vmem:[#allocation10 + $0x8] sm:$0xff] }
 0x326   :  { %1749 = vmatprep.subr.bf16.mxu1 %v3881_v8  ;;  %v3417_v8 = vcombine.low %v4432_v5, %v4434_v6 }
 0x329   :  { %1750 = vmatpush1.bf16.msra.mxu1 %v3879_v9  ;;  %v3418_v9 = vcombine.high %v4432_v5, %v4434_v6 }
 0x32a   :  { %1751 = vmatprep.subr.bf16.mxu1 %v3884_v10  ;;  %v2048_v10 = vld [vmem:[#allocation10 + $0x28] sm:$0xff] }
 0x32d   :  { %1752 = vmatpush1.bf16.msra.mxu1 %v3882_v11  ;;  %v3419_v11 = vcombine.low %v2044_v7, %v2048_v10 }
 0x32e   :  { %1753 = vmatprep.subr.bf16.mxu1 %v3887_v14  ;;  %v3420_v14 = vcombine.high %v2044_v7, %v2048_v10 }
 0x330   :  { %2894 = vmatprep.subr.bf16.mxu0 %v3420_v14 }
 0x331   :  { %1754 = vmatpush1.bf16.msra.mxu1 %v3885_v18  ;;  %v2056_v18 = vld [vmem:[#allocation10 + $0x68] sm:$0xff]  ;;  %2895 = vmatpush1.bf16.msra.mxu0 %v3419_v11 }
 0x332   :  { %1755 = vmatprep.subr.bf16.mxu1 %v3890_v19  ;;  %v3428_v19 = vcombine.high %v2052_v15, %v2056_v18 }
 0x334   :  { %2896 = vmatprep.subr.bf16.mxu0 %v3428_v19 }
 0x335   :  { %1756 = vmatpush1.bf16.msra.mxu1 %v3888_v20  ;;  %v3427_v20 = vcombine.low %v2052_v15, %v2056_v18 }
 0x336   :  { %1994 = vmatprep.subr.bf16.mxu1 %v3893_v21  ;;  %v2060_v21 = vld [vmem:[#allocation10 + $0x88] sm:$0xff] }
 0x337   :  { %2897 = vmatpush1.bf16.msra.mxu0 %v3427_v20 }
 0x3eb   :  { %v1618_v12 = vpop.f32.mrb[4].mxu1 }
 0x3ec   :  { %v1619_v25 = vadd.f32 %v1618_v12, %v1417_v23  ;;  %v1620_v26 = vpop.f32.mrb[5].mxu1  ;;  %v3436_v23 = vcombine.high %v2060_v21, %v2064_v22  ;;  %v2068_v12 = vld [vmem:[#allocation10 + $0xc8] sm:$0xff] }
 0x3ed   :  { %v1621_v27 = vadd.f32 %v1620_v26, %v1421_v24  ;;  %v1622_v28 = vpop.f32.mrb[6].mxu1  ;;  %v3435_v24 = vcombine.low %v2060_v21, %v2064_v22 }
 0x3ee   :  { %3140 = vst [vmem:[#allocation11] sm:$0x3] %v1619_v25  ;;  %v1623_v16 = vpop.f32.mrb[7].mxu1  ;;  %2898 = vmatprep.subr.bf16.mxu0 %v3436_v23  ;;  %v2076_v28 = vld [vmem:[#allocation10 + $0x108] sm:$0xff]  ;;  %v2051_v23 = vld [vmem:[#allocation10 + $0x40] sm:$0xff] }
 0x3ef   :  { %v1625_v29 = vmul.f32 0.5, %v1621_v27  ;;  %3141 = vst [vmem:[#allocation12] sm:$0x3] %v1621_v27  ;;  %2899 = vmatpush1.bf16.msra.mxu0 %v3435_v24  ;;  %v2080_v16 = vld [vmem:[#allocation10 + $0x128] sm:$0xff]  ;;  %v2055_v24 = vld [vmem:[#allocation10 + $0x60] sm:$0xff] }
 0x3f1   :  { %v1626_v30 = vmul.f32 1.442695, %v1625_v29  ;;  %v3452_v29 = vcombine.high %v2076_v28, %v2080_v16 }
 0x3f3   :  { %3939 = vpow2.f32 %v1626_v30  ;;  %v3451_v30 = vcombine.low %v2076_v28, %v2080_v16  ;;  %v2059_v28 = vld [vmem:[#allocation10 + $0x80] sm:$0xff] }
 0x3f4   :  { %v2063_v16 = vld [vmem:[#allocation10 + $0xa0] sm:$0xff] }
 0x3fd   :  { %v3940_v33 = vpop.eup %3939 }
 0x3fe   :  { %v1630_v17 = vmul.f32 %v3940_v33, %v1629_v32  ;;  %v2088_v32 = vld [vmem:[#allocation10 + $0x168] sm:$0xff] }
 0x3ff   :  { %v3460_v33 = vcombine.high %v2084_v31, %v2088_v32 }
 0x400   :  { %v1631_v34 = vadd.f32 %v1630_v17, %v1619_v25  ;;  %v2072_v25 = vld [vmem:[#allocation10 + $0xe8] sm:$0xff]  ;;  %v3459_v17 = vcombine.low %v2084_v31, %v2088_v32  ;;  %v2067_v31 = vld [vmem:[#allocation10 + $0xc0] sm:$0xff] }
 0x401   :  { %v3444_v26 = vcombine.high %v2068_v12, %v2072_v25  ;;  %v3443_v27 = vcombine.low %v2068_v12, %v2072_v25  ;;  %v2071_v32 = vld [vmem:[#allocation10 + $0xe0] sm:$0xff] }
 0x402   :  { %v1632_v36 = vpack.c.bf16 %v1631_v34, %v1631_v34  ;;  %v2092_v34 = vld [vmem:[#allocation10 + $0x188] sm:$0xff] }
 0x403   :  { %2900 = vmatprep.subr.bf16.mxu0 %v3444_v26 }
 0x404   :  { %1774 = vmatmul.mubr.bf16.vlgmr.msra.gmra.mrb[8].mxu1 %v1632_v36  ;;  %2901 = vmatpush1.bf16.msra.mxu0 %v3443_v27  ;;  %v3426_v27 = vcombine.high %v2051_v23, %v2055_v24 }
 0x405   :  { %1995 = vmatpush1.bf16.msra.mxu1 %v3891_v35  ;;  %2902 = vmatprep.subr.bf16.mxu0 %v3452_v29  ;;  %v2096_v35 = vld [vmem:[#allocation10 + $0x1a8] sm:$0xff]  ;;  %v3425_v29 = vcombine.low %v2051_v23, %v2055_v24 }
 0x406   :  { %1996 = vmatprep.subr.bf16.mxu1 %v3896_v37  ;;  %v3468_v36 = vcombine.high %v2092_v34, %v2096_v35  ;;  %v3467_v37 = vcombine.low %v2092_v34, %v2096_v35  ;;  %v2075_v34 = vld [vmem:[#allocation10 + $0x100] sm:$0xff] }
 0x407   :  { %v2079_v35 = vld [vmem:[#allocation10 + $0x120] sm:$0xff] }
 0x408   :  { %2903 = vmatpush1.bf16.msra.mxu0 %v3451_v30  ;;  %v3434_v30 = vcombine.high %v2059_v28, %v2063_v16  ;;  %v3449_v5 = vcombine.low %v2075_v34, %v2079_v35 }
 0x409   :  { %1997 = vmatpush1.bf16.msra.mxu1 %v3894_v38  ;;  %2904 = vmatprep.subr.bf16.mxu0 %v3460_v33  ;;  %v2100_v38 = vld [vmem:[#allocation10 + $0x1c8] sm:$0xff]  ;;  %v3433_v33 = vcombine.low %v2059_v28, %v2063_v16 }
 0x40a   :  { %1998 = vmatprep.subr.bf16.mxu1 %v3899_v39  ;;  %v2104_v39 = vld [vmem:[#allocation10 + $0x1e8] sm:$0xff] }
 0x40b   :  { %v2168_v28 = vld [vmem:[#allocation10 + $0x3e8] sm:$0xff] }
 0x40c   :  { %2905 = vmatpush1.bf16.msra.mxu0 %v3459_v17  ;;  %v3442_v17 = vcombine.high %v2067_v31, %v2071_v32 }
 0x40d   :  { %1999 = vmatpush1.bf16.msra.mxu1 %v3897_v40  ;;  %2906 = vmatprep.subr.bf16.mxu0 %v3468_v36  ;;  %v3476_v40 = vcombine.high %v2100_v38, %v2104_v39  ;;  %v3441_v36 = vcombine.low %v2067_v31, %v2071_v32  ;;  %v2045_v31 = vld [vmem:[#allocation10 + $0x10] sm:$0xff] }
 0x40e   :  { %2000 = vmatprep.subr.bf16.mxu1 %v3902_v41  ;;  %v3475_v41 = vcombine.low %v2100_v38, %v2104_v39  ;;  %v2083_v38 = vld [vmem:[#allocation10 + $0x140] sm:$0xff]  ;;  %v2049_v32 = vld [vmem:[#allocation10 + $0x30] sm:$0xff] }
 0x40f   :  { %v2087_v39 = vld [vmem:[#allocation10 + $0x160] sm:$0xff] }
 0x410   :  { %2907 = vmatpush1.bf16.msra.mxu0 %v3467_v37  ;;  %v3450_v37 = vcombine.high %v2075_v34, %v2079_v35  ;;  %v3458_v6 = vcombine.high %v2083_v38, %v2087_v39  ;;  %v2050_v34 = vld [vmem:[#allocation10 + $0x38] sm:$0xff]  ;;  %v3421_v35 = vcombine.low %v2045_v31, %v2049_v32 }
 0x411   :  { %2001 = vmatpush1.bf16.msra.mxu1 %v3900_v42  ;;  %2908 = vmatprep.subr.bf16.mxu0 %v3476_v40  ;;  %v2108_v42 = vld [vmem:[#allocation10 + $0x208] sm:$0xff]  ;;  %v2095_v40 = vld [vmem:[#allocation10 + $0x1a0] sm:$0xff] }
 0x412   :  { %2002 = vmatprep.subr.bf16.mxu1 %v3905_v43  ;;  %v2112_v43 = vld [vmem:[#allocation10 + $0x228] sm:$0xff] }
 0x414   :  { %2909 = vmatpush1.bf16.msra.mxu0 %v3475_v41  ;;  %v3457_v41 = vcombine.low %v2083_v38, %v2087_v39  ;;  %v1822_v38 = vld [vmem:[%s4533_s11] sm:$0x3]  ;;  %s4148_s11 = smov [#allocation11]  }
 0x415   :  { %2003 = vmatpush1.bf16.msra.mxu1 %v3903_v44  ;;  %v3484_v44 = vcombine.high %v2108_v42, %v2112_v43  ;;  %v1827_v39 = vrot.slane %v1822_v38, %v4361_v62  ;;  %s3150_s27 = sshll.u32 %s4148_s11, 4  ;;  %s3151_s27 = int_to_ptr.vmem [resolvable:$true] %s3150_s27 }
 0x416   :  { %2004 = vmatprep.subr.bf16.mxu1 %v3908_v45  ;;  %v3483_v45 = vcombine.low %v2108_v42, %v2112_v43  ;;  %v2099_v43 = vld [vmem:[#allocation10 + $0x1c0] sm:$0xff]  ;;  %s4083_s2 = scalar_lea.vmem %s3151_s27, 32  ;;  %p4088_p13 = scmp.lt.s32.totalorder %s3151_s27, %s3151_s27 }
 0x417   :  { %2910 = vmatprep.subr.bf16.mxu0 %v3484_v44  ;;  %v2103_v44 = vld [vmem:[#allocation10 + $0x1e0] sm:$0xff]  ;;  %p4084_p12 = scmp.ne.s32.totalorder %s3151_s27, %s4083_s2  ;;  %p4089_p0 = scmp.lt.s32.totalorder %s4083_s2, %s4083_s2 }
 0x418   :  { %2911 = vmatpush1.bf16.msra.mxu0 %v3483_v45 }
 0x419   :  { %2005 = vmatpush1.bf16.msra.mxu1 %v3906_v46  ;;  %v2116_v46 = vld [vmem:[#allocation10 + $0x248] sm:$0xff]  ;;  %p4090_p1 = por %p4089_p0, %p4088_p13 }
 0x41a   :  { %2006 = vmatprep.subr.bf16.mxu1 %v3911_v47  ;;  %v2120_v47 = vld [vmem:[#allocation10 + $0x268] sm:$0xff] }
 0x41b   :  { %p4091_p2 = pnand %p4090_p1, %p4084_p12 }
 0x41d   :  { %2007 = vmatpush1.bf16.msra.mxu1 %v3909_v48  ;;  %v3492_v48 = vcombine.high %v2116_v46, %v2120_v47 }
 0x41e   :  { %2008 = vmatprep.subr.bf16.mxu1 %v3914_v49  ;;  %v3491_v49 = vcombine.low %v2116_v46, %v2120_v47  ;;  %v3474_v46 = vcombine.high %v2099_v43, %v2103_v44  ;;  %v2107_v47 = vld [vmem:[#allocation10 + $0x200] sm:$0xff] }
 0x41f   :  { %2912 = vmatprep.subr.bf16.mxu0 %v3492_v48  ;;  %v2111_v48 = vld [vmem:[#allocation10 + $0x220] sm:$0xff] }
 0x420   :  { %2913 = vmatpush1.bf16.msra.mxu0 %v3491_v49  ;;  %v3473_v49 = vcombine.low %v2099_v43, %v2103_v44 }
 0x421   :  { %2009 = vmatpush1.bf16.msra.mxu1 %v3912_v50  ;;  %v2124_v50 = vld [vmem:[#allocation10 + $0x288] sm:$0xff] }
 0x422   :  { %2010 = vmatprep.subr.bf16.mxu1 %v3917_v51  ;;  %v2128_v51 = vld [vmem:[#allocation10 + $0x2a8] sm:$0xff] }
 0x425   :  { %2011 = vmatpush1.bf16.msra.mxu1 %v3915_v52  ;;  %v3500_v52 = vcombine.high %v2124_v50, %v2128_v51 }
 0x426   :  { %2012 = vmatprep.subr.bf16.mxu1 %v3920_v53  ;;  %v3499_v53 = vcombine.low %v2124_v50, %v2128_v51  ;;  %v3482_v50 = vcombine.high %v2107_v47, %v2111_v48  ;;  %v2115_v51 = vld [vmem:[#allocation10 + $0x240] sm:$0xff] }
 0x427   :  { %2914 = vmatprep.subr.bf16.mxu0 %v3500_v52  ;;  %v2119_v52 = vld [vmem:[#allocation10 + $0x260] sm:$0xff] }
 0x428   :  { %2915 = vmatpush1.bf16.msra.mxu0 %v3499_v53  ;;  %v3481_v53 = vcombine.low %v2107_v47, %v2111_v48  ;;  %v2053_v47 = vld [vmem:[#allocation10 + $0x50] sm:$0xff] }
 0x429   :  { %2013 = vmatpush1.bf16.msra.mxu1 %v3918_v54  ;;  %v2132_v54 = vld [vmem:[#allocation10 + $0x2c8] sm:$0xff] }
 0x42a   :  { %2014 = vmatprep.subr.bf16.mxu1 %v3923_v55  ;;  %v2136_v55 = vld [vmem:[#allocation10 + $0x2e8] sm:$0xff] }
 0x42d   :  { %2015 = vmatpush1.bf16.msra.mxu1 %v3921_v56  ;;  %v3508_v56 = vcombine.high %v2132_v54, %v2136_v55 }
 0x42e   :  { %2016 = vmatprep.subr.bf16.mxu1 %v3926_v57  ;;  %v3507_v57 = vcombine.low %v2132_v54, %v2136_v55  ;;  %v3490_v54 = vcombine.high %v2115_v51, %v2119_v52  ;;  %v2123_v55 = vld [vmem:[#allocation10 + $0x280] sm:$0xff] }
 0x42f   :  { %2916 = vmatprep.subr.bf16.mxu0 %v3508_v56  ;;  %v2127_v56 = vld [vmem:[#allocation10 + $0x2a0] sm:$0xff] }
 0x430   :  { %2917 = vmatpush1.bf16.msra.mxu0 %v3507_v57  ;;  %v3489_v57 = vcombine.low %v2115_v51, %v2119_v52  ;;  %v2058_v51 = vld [vmem:[#allocation10 + $0x78] sm:$0xff] }
 0x431   :  { %2017 = vmatpush1.bf16.msra.mxu1 %v3924_v58  ;;  %v2140_v58 = vld [vmem:[#allocation10 + $0x308] sm:$0xff] }
 0x432   :  { %2018 = vmatprep.subr.bf16.mxu1 %v3929_v59  ;;  %v2144_v59 = vld [vmem:[#allocation10 + $0x328] sm:$0xff] }
 0x435   :  { %2019 = vmatpush1.bf16.msra.mxu1 %v3927_v60  ;;  %v3516_v60 = vcombine.high %v2140_v58, %v2144_v59 }
 0x436   :  { %2020 = vmatprep.subr.bf16.mxu1 %v3932_v61  ;;  %v3515_v61 = vcombine.low %v2140_v58, %v2144_v59  ;;  %v3498_v58 = vcombine.high %v2123_v55, %v2127_v56  ;;  %v2131_v59 = vld [vmem:[#allocation10 + $0x2c0] sm:$0xff] }
 0x437   :  { %2918 = vmatprep.subr.bf16.mxu0 %v3516_v60  ;;  %v2135_v60 = vld [vmem:[#allocation10 + $0x2e0] sm:$0xff] }
 0x438   :  { %2919 = vmatpush1.bf16.msra.mxu0 %v3515_v61  ;;  %v3497_v61 = vcombine.low %v2123_v55, %v2127_v56 }
 0x439   :  { %2021 = vmatpush1.bf16.msra.mxu1 %v3930_v63  ;;  %v2148_v63 = vld [vmem:[#allocation10 + $0x348] sm:$0xff] }
 0x43a   :  { %2022 = vmatprep.subr.bf16.mxu1 %v3935_v1  ;;  %v2152_v1 = vld [vmem:[#allocation10 + $0x368] sm:$0xff] }
 0x43d   :  { %2023 = vmatpush1.bf16.msra.mxu1 %v3933_v2  ;;  %v3524_v2 = vcombine.high %v2148_v63, %v2152_v1 }
 0x43e   :  { %2024 = vmatprep.subr.bf16.mxu1 %v3938_v3  ;;  %v3523_v3 = vcombine.low %v2148_v63, %v2152_v1  ;;  %v3506_v63 = vcombine.high %v2131_v59, %v2135_v60  ;;  %v2139_v1 = vld [vmem:[#allocation10 + $0x300] sm:$0xff] }
 0x43f   :  { %2920 = vmatprep.subr.bf16.mxu0 %v3524_v2  ;;  %v2143_v2 = vld [vmem:[#allocation10 + $0x320] sm:$0xff] }
 0x440   :  { %2921 = vmatpush1.bf16.msra.mxu0 %v3523_v3  ;;  %v3505_v3 = vcombine.low %v2131_v59, %v2135_v60  ;;  %v2066_v59 = vld [vmem:[#allocation10 + $0xb8] sm:$0xff] }
 0x441   :  { %2025 = vmatpush1.bf16.msra.mxu1 %v3936_v4  ;;  %v1649_v4 = vld [vmem:[%s4531_s9] sm:$0x3] }
 0x442   :  { %2853 = vmatprep.subr.bf16.mxu1 %v3418_v9  ;;  %v1654_v7 = vrot.slane %v1649_v4, %v4361_v62  ;;  %v1658_v9 = vrot.slane %v1649_v4, %v4367_v0  ;;  %v3514_v4 = vcombine.high %v2139_v1, %v2143_v2 }
 0x4d7   :  { %v1775_v10 = vpop.f32.mrb[8].mxu1 }
 0x4d8   :  { %v1776_v11 = vadd.f32 %v1775_v10, %v1654_v7  ;;  %v1777_v14 = vpop.f32.mrb[9].mxu1  ;;  %v2147_v7 = vld [vmem:[#allocation10 + $0x340] sm:$0xff]  ;;  %v3513_v10 = vcombine.low %v2139_v1, %v2143_v2  ;;  %v2069_v2 = vld [vmem:[#allocation10 + $0xd0] sm:$0xff] }
 0x4d9   :  { %v1778_v15 = vadd.f32 %v1777_v14, %v1658_v9  ;;  %v1779_v18 = vpop.f32.mrb[10].mxu1  ;;  %v2151_v9 = vld [vmem:[#allocation10 + $0x360] sm:$0xff] }
 0x4da   :  { %vm1782_vm4 = vcmp.ge.f32.partialorder %v1776_v11, 0.0  ;;  %v1784_v19 = vmul.f32 0.2, %v1776_v11  ;;  %v1780_v20 = vpop.f32.mrb[11].mxu1  ;;  %v3521_v14 = vcombine.low %v2147_v7, %v2151_v9  ;;  %v2159_v18 = vld [vmem:[#allocation10 + $0x3a0] sm:$0xff] }
 0x4db   :  { %vm1783_vm5 = vcmp.ge.f32.partialorder %v1778_v15, 0.0  ;;  %v1785_v21 = vmul.f32 0.2, %v1778_v15 }
 0x4dc   :  { %v1786_v22 = vsel %vm1782_vm4, %v1776_v11, %v1784_v19  ;;  %v3522_v11 = vcombine.high %v2147_v7, %v2151_v9  ;;  %v2156_v19 = vld [vmem:[#allocation10 + $0x388] sm:$0xff]  ;;  %v2074_v7 = vld [vmem:[#allocation10 + $0xf8] sm:$0xff] }
 0x4dd   :  { %v1787_v12 = vsel %vm1783_vm5, %v1778_v15, %v1785_v21  ;;  %v1788_v26 = vpack.c.bf16 %v1786_v22, %v1786_v22  ;;  %v2155_v15 = vld [vmem:[#allocation10 + $0x380] sm:$0xff]  ;;  %v2160_v21 = vld [vmem:[#allocation10 + $0x3a8] sm:$0xff] }
 0x4de   :  { %v1789_v25 = vpack.c.bf16 %v1787_v12, %v1787_v12  ;;  %v3530_v20 = vcombine.high %v2155_v15, %v2159_v18  ;;  %v3529_v22 = vcombine.low %v2155_v15, %v2159_v18  ;;  %v3531_v23 = vcombine.low %v2156_v19, %v2160_v21  ;;  %v2163_v12 = vld [vmem:[#allocation10 + $0x3c0] sm:$0xff]  ;;  %v2077_v15 = vld [vmem:[#allocation10 + $0x110] sm:$0xff] }
 0x4df   :  { %v3532_v24 = vcombine.high %v2156_v19, %v2160_v21  ;;  %v2081_v18 = vld [vmem:[#allocation10 + $0x130] sm:$0xff]  ;;  %v2078_v19 = vld [vmem:[#allocation10 + $0x118] sm:$0xff] }
 0x4e0   :  { %2026 = vmatprep.mubr.bf16.mxu1 %v1789_v25  ;;  %v2167_v25 = vld [vmem:[#allocation10 + $0x3e0] sm:$0xff] }
 0x4e1   :  { %2027 = vmatmul.mubr.bf16.vlgmr.msra.gmra.mrb[12].mxu1 %v1788_v26  ;;  %2922 = vmatprep.subr.bf16.mxu0 %v3532_v24  ;;  %v2164_v26 = vld [vmem:[#allocation10 + $0x3c8] sm:$0xff]  ;;  %v3537_v16 = vcombine.low %v2163_v12, %v2167_v25 }
 0x4e2   :  { %2854 = vmatpush1.bf16.msra.mxu1 %v3417_v8  ;;  %v2091_v8 = vld [vmem:[#allocation10 + $0x180] sm:$0xff]  ;;  %2923 = vmatpush1.bf16.msra.mxu0 %v3531_v23  ;;  %v3454_v23 = vcombine.high %v2077_v15, %v2081_v18 }
 0x4e3   :  { %2855 = vmatprep.subr.bf16.mxu1 %v3426_v27  ;;  %v3466_v42 = vcombine.high %v2091_v8, %v2095_v40  ;;  %v3465_v45 = vcombine.low %v2091_v8, %v2095_v40  ;;  %v3538_v27 = vcombine.high %v2163_v12, %v2167_v25  ;;  %v2085_v12 = vld [vmem:[#allocation10 + $0x150] sm:$0xff] }
 0x4e4   :  { %v2089_v25 = vld [vmem:[#allocation10 + $0x170] sm:$0xff] }
 0x4e6   :  { %2856 = vmatpush1.bf16.msra.mxu1 %v3425_v29  ;;  %v3539_v29 = vcombine.low %v2164_v26, %v2168_v28 }
 0x4e7   :  { %2857 = vmatprep.subr.bf16.mxu1 %v3434_v30  ;;  %v3540_v30 = vcombine.high %v2164_v26, %v2168_v28  ;;  %v2086_v26 = vld [vmem:[#allocation10 + $0x158] sm:$0xff]  ;;  %v3453_v28 = vcombine.low %v2077_v15, %v2081_v18 }
 0x4e9   :  { %2924 = vmatprep.subr.bf16.mxu0 %v3540_v30 }
 0x4ea   :  { %2858 = vmatpush1.bf16.msra.mxu1 %v3433_v33  ;;  %v2046_v33 = vld [vmem:[#allocation10 + $0x18] sm:$0xff]  ;;  %2925 = vmatpush1.bf16.msra.mxu0 %v3539_v29  ;;  %v3462_v29 = vcombine.high %v2085_v12, %v2089_v25 }
 0x4eb   :  { %2859 = vmatprep.subr.bf16.mxu1 %v3442_v17  ;;  %v3422_v17 = vcombine.high %v2045_v31, %v2049_v32  ;;  %v2093_v31 = vld [vmem:[#allocation10 + $0x190] sm:$0xff] }
 0x4ec   :  { %v2097_v32 = vld [vmem:[#allocation10 + $0x1b0] sm:$0xff] }
 0x4ee   :  { %2860 = vmatpush1.bf16.msra.mxu1 %v3441_v36  ;;  %v3423_v36 = vcombine.low %v2046_v33, %v2050_v34 }
 0x4ef   :  { %2861 = vmatprep.subr.bf16.mxu1 %v3450_v37  ;;  %v3424_v37 = vcombine.high %v2046_v33, %v2050_v34  ;;  %v2094_v33 = vld [vmem:[#allocation10 + $0x198] sm:$0xff]  ;;  %v3461_v34 = vcombine.low %v2085_v12, %v2089_v25 }
 0x4f1   :  { %2976 = vmatprep.subr.bf16.mxu0 %v3424_v37 }
 0x4f2   :  { %2862 = vmatpush1.bf16.msra.mxu1 %v3449_v5  ;;  %v1831_v5 = vrot.slane %v1822_v38, %v4367_v0  ;;  %v2101_v38 = vld [vmem:[#allocation10 + $0x1d0] sm:$0xff] }
 0x4f3   :  { %2863 = vmatprep.subr.bf16.mxu1 %v3458_v6 }
 0x4f6   :  { %2864 = vmatpush1.bf16.msra.mxu1 %v3457_v41 }
 0x4f7   :  { %2865 = vmatprep.subr.bf16.mxu1 %v3466_v42 }
 0x4fa   :  { %2866 = vmatpush1.bf16.msra.mxu1 %v3465_v45 }
 0x4fb   :  { %2867 = vmatprep.subr.bf16.mxu1 %v3474_v46 }
 0x4fe   :  { %2868 = vmatpush1.bf16.msra.mxu1 %v3473_v49  ;;  %v2057_v49 = vld [vmem:[#allocation10 + $0x70] sm:$0xff] }
 0x4ff   :  { %2869 = vmatprep.subr.bf16.mxu1 %v3482_v50  ;;  %v2054_v50 = vld [vmem:[#allocation10 + $0x58] sm:$0xff]  ;;  %v3430_v55 = vcombine.high %v2053_v47, %v2057_v49  ;;  %v3429_v60 = vcombine.low %v2053_v47, %v2057_v49 }
 0x500   :  { %v3432_v56 = vcombine.high %v2054_v50, %v2058_v51 }
 0x502   :  { %2870 = vmatpush1.bf16.msra.mxu1 %v3481_v53 }
 0x503   :  { %2871 = vmatprep.subr.bf16.mxu1 %v3490_v54  ;;  %v2061_v54 = vld [vmem:[#allocation10 + $0x90] sm:$0xff] }
 0x506   :  { %2872 = vmatpush1.bf16.msra.mxu1 %v3489_v57  ;;  %v2065_v57 = vld [vmem:[#allocation10 + $0xb0] sm:$0xff] }
 0x507   :  { %2873 = vmatprep.subr.bf16.mxu1 %v3498_v58  ;;  %v2062_v58 = vld [vmem:[#allocation10 + $0x98] sm:$0xff]  ;;  %v3437_v9 = vcombine.low %v2061_v54, %v2065_v57 }
 0x508   :  { %v3440_v1 = vcombine.high %v2062_v58, %v2066_v59 }
 0x50a   :  { %2874 = vmatpush1.bf16.msra.mxu1 %v3497_v61  ;;  %v3431_v61 = vcombine.low %v2054_v50, %v2058_v51  ;;  %v2117_v51 = vld [vmem:[#allocation10 + $0x250] sm:$0xff] }
 0x50b   :  { %2875 = vmatprep.subr.bf16.mxu1 %v3506_v63  ;;  %v3438_v63 = vcombine.high %v2061_v54, %v2065_v57  ;;  %v2118_v54 = vld [vmem:[#allocation10 + $0x258] sm:$0xff] }
 0x50e   :  { %2876 = vmatpush1.bf16.msra.mxu1 %v3505_v3  ;;  %v2073_v3 = vld [vmem:[#allocation10 + $0xf0] sm:$0xff] }
 0x50f   :  { %2877 = vmatprep.subr.bf16.mxu1 %v3514_v4  ;;  %v2070_v4 = vld [vmem:[#allocation10 + $0xd8] sm:$0xff]  ;;  %v3445_v21 = vcombine.low %v2069_v2, %v2073_v3 }
 0x512   :  { %2878 = vmatpush1.bf16.msra.mxu1 %v3513_v10  ;;  %v3439_v10 = vcombine.low %v2062_v58, %v2066_v59 }
 0x513   :  { %2879 = vmatprep.subr.bf16.mxu1 %v3522_v11  ;;  %v3446_v11 = vcombine.high %v2069_v2, %v2073_v3 }
 0x516   :  { %2880 = vmatpush1.bf16.msra.mxu1 %v3521_v14  ;;  %v3448_v14 = vcombine.high %v2070_v4, %v2074_v7 }
 0x517   :  { %2881 = vmatprep.subr.bf16.mxu1 %v3530_v20  ;;  %v2082_v20 = vld [vmem:[#allocation10 + $0x138] sm:$0xff] }
 0x518   :  { %v3456_v24 = vcombine.high %v2078_v19, %v2082_v20 }
 0x51a   :  { %2882 = vmatpush1.bf16.msra.mxu1 %v3529_v22  ;;  %v3447_v22 = vcombine.low %v2070_v4, %v2074_v7 }
 0x51b   :  { %2883 = vmatprep.subr.bf16.mxu1 %v3538_v27  ;;  %v2090_v27 = vld [vmem:[#allocation10 + $0x178] sm:$0xff] }
 0x51c   :  { %v3464_v30 = vcombine.high %v2086_v26, %v2090_v27 }
 0x51e   :  { %2884 = vmatpush1.bf16.msra.mxu1 %v3537_v16  ;;  %v3455_v16 = vcombine.low %v2078_v19, %v2082_v20 }
 0x51f   :  { %2935 = vmatprep.subr.bf16.mxu1 %v3422_v17  ;;  %v2098_v17 = vld [vmem:[#allocation10 + $0x1b8] sm:$0xff] }
 0x520   :  { %v3472_v37 = vcombine.high %v2094_v33, %v2098_v17 }
 0x5b4   :  { %v2028_v6 = vpop.f32.mrb[12].mxu1 }
 0x5b5   :  { %v2029_v8 = vadd.f32 %v2028_v6, %v1827_v39  ;;  %v2030_v40 = vpop.f32.mrb[13].mxu1  ;;  %v2105_v39 = vld [vmem:[#allocation10 + $0x1f0] sm:$0xff]  ;;  %v2106_v6 = vld [vmem:[#allocation10 + $0x1f8] sm:$0xff] }
 0x5b6   :  { %v2031_v41 = vadd.f32 %v2030_v40, %v1831_v5  ;;  %v2032_v42 = vpop.f32.mrb[14].mxu1  ;;  %v2102_v5 = vld [vmem:[#allocation10 + $0x1d8] sm:$0xff]  ;;  %v3471_v40 = vcombine.low %v2094_v33, %v2098_v17  ;;  %v3477_v47 = vcombine.low %v2101_v38, %v2105_v39 }
 0x5b7   :  { %vm2035_vm6 = vcmp.ge.f32.partialorder %v2029_v8, 0.0  ;;  %v2037_v43 = vmul.f32 0.2, %v2029_v8  ;;  %v2033_v44 = vpop.f32.mrb[15].mxu1  ;;  %v3480_v42 = vcombine.high %v2102_v5, %v2106_v6 }
 0x5b8   :  { %vm2036_vm7 = vcmp.ge.f32.partialorder %v2031_v41, 0.0  ;;  %v2038_v45 = vmul.f32 0.2, %v2031_v41  ;;  %v2113_v44 = vld [vmem:[#allocation10 + $0x230] sm:$0xff] }
 0x5b9   :  { %v2039_v46 = vsel %vm2035_vm6, %v2029_v8, %v2037_v43  ;;  %v3469_v8 = vcombine.low %v2093_v31, %v2097_v32  ;;  %v2109_v43 = vld [vmem:[#allocation10 + $0x210] sm:$0xff] }
 0x5ba   :  { %v2040_v48 = vsel %vm2036_vm7, %v2031_v41, %v2038_v45  ;;  %v4453_v53 = vpack.c.bf16 %v2039_v46, %v2039_v46  ;;  %v3478_v41 = vcombine.high %v2101_v38, %v2105_v39  ;;  %v2110_v45 = vld [vmem:[#allocation10 + $0x218] sm:$0xff]  ;;  %v3486_v49 = vcombine.high %v2109_v43, %v2113_v44 }
 0x5bb   :  { %v2042_v52 = vpack.c.bf16 %v2040_v48, %v2040_v48  ;;  %v2114_v46 = vld [vmem:[#allocation10 + $0x238] sm:$0xff]  ;;  %v3479_v48 = vcombine.low %v2102_v5, %v2106_v6 }
 0x5bc   :  { %v3488_v50 = vcombine.high %v2110_v45, %v2114_v46  ;;  %v3487_v57 = vcombine.low %v2110_v45, %v2114_v46 }
 0x5bd   :  { %2885 = vmatprep.mubr.bf16.mxu1 %v2042_v52  ;;  %2926 = vmatprep.mubr.bf16.mxu0 %v2042_v52 }
 0x5be   :  { %2886 = vmatmul.mubr.bf16.vlgmr.msra.gmra.mrb[16].mxu1 %v4453_v53  ;;  %2927 = vmatmul.mubr.bf16.vlgmr.msra.gmra.mrb[4].mxu0 %v4453_v53 }
 0x5bf   :  { %2936 = vmatpush1.bf16.msra.mxu1 %v3421_v35  ;;  %2977 = vmatpush1.bf16.msra.mxu0 %v3423_v36  ;;  %v3463_v35 = vcombine.low %v2086_v26, %v2090_v27  ;;  %v3470_v36 = vcombine.high %v2093_v31, %v2097_v32 }
 0x5c0   :  { %2967 = vmatprep.mubr.bf16.mxu1 %v2042_v52  ;;  %3008 = vmatprep.mubr.bf16.mxu0 %v2042_v52  ;;  %v2121_v52 = vld [vmem:[#allocation10 + $0x270] sm:$0xff] }
 0x5c1   :  { %2937 = vmatprep.subr.bf16.mxu1 %v3430_v55  ;;  %2978 = vmatprep.subr.bf16.mxu0 %v3432_v56  ;;  %v2122_v55 = vld [vmem:[#allocation10 + $0x278] sm:$0xff]  ;;  %v3485_v56 = vcombine.low %v2109_v43, %v2113_v44  ;;  %v3494_v58 = vcombine.high %v2117_v51, %v2121_v52  ;;  %v3493_v2 = vcombine.low %v2117_v51, %v2121_v52 }
 0x5c2   :  { %v3496_v59 = vcombine.high %v2118_v54, %v2122_v55  ;;  %v3495_v3 = vcombine.low %v2118_v54, %v2122_v55 }
 0x5c3   :  { %2938 = vmatpush1.bf16.msra.mxu1 %v3429_v60  ;;  %2979 = vmatpush1.bf16.msra.mxu0 %v3431_v61  ;;  %v2125_v60 = vld [vmem:[#allocation10 + $0x290] sm:$0xff] }
 0x5c4   :  { %2939 = vmatprep.subr.bf16.mxu1 %v3438_v63  ;;  %2980 = vmatprep.subr.bf16.mxu0 %v3440_v1  ;;  %v2129_v61 = vld [vmem:[#allocation10 + $0x2b0] sm:$0xff]  ;;  %v2126_v63 = vld [vmem:[#allocation10 + $0x298] sm:$0xff] }
 0x5c5   :  { %v2130_v1 = vld [vmem:[#allocation10 + $0x2b8] sm:$0xff]  ;;  %v3502_v4 = vcombine.high %v2125_v60, %v2129_v61  ;;  %v3501_v15 = vcombine.low %v2125_v60, %v2129_v61 }
 0x5c6   :  { %v3504_v7 = vcombine.high %v2126_v63, %v2130_v1  ;;  %v3503_v18 = vcombine.low %v2126_v63, %v2130_v1 }
 0x5c7   :  { %2940 = vmatpush1.bf16.msra.mxu1 %v3437_v9  ;;  %2981 = vmatpush1.bf16.msra.mxu0 %v3439_v10  ;;  %v2133_v9 = vld [vmem:[#allocation10 + $0x2d0] sm:$0xff] }
 0x5c8   :  { %2941 = vmatprep.subr.bf16.mxu1 %v3446_v11  ;;  %2982 = vmatprep.subr.bf16.mxu0 %v3448_v14  ;;  %v2137_v10 = vld [vmem:[#allocation10 + $0x2f0] sm:$0xff]  ;;  %v2134_v11 = vld [vmem:[#allocation10 + $0x2d8] sm:$0xff] }
 0x5c9   :  { %v2138_v14 = vld [vmem:[#allocation10 + $0x2f8] sm:$0xff]  ;;  %v3510_v19 = vcombine.high %v2133_v9, %v2137_v10  ;;  %v3509_v12 = vcombine.low %v2133_v9, %v2137_v10 }
 0x5ca   :  { %v3512_v20 = vcombine.high %v2134_v11, %v2138_v14  ;;  %v3511_v25 = vcombine.low %v2134_v11, %v2138_v14 }
 0x5cb   :  { %2942 = vmatpush1.bf16.msra.mxu1 %v3445_v21  ;;  %2983 = vmatpush1.bf16.msra.mxu0 %v3447_v22  ;;  %v2141_v21 = vld [vmem:[#allocation10 + $0x310] sm:$0xff] }
 0x5cc   :  { %2943 = vmatprep.subr.bf16.mxu1 %v3454_v23  ;;  %2984 = vmatprep.subr.bf16.mxu0 %v3456_v24  ;;  %v2145_v22 = vld [vmem:[#allocation10 + $0x330] sm:$0xff]  ;;  %v2142_v23 = vld [vmem:[#allocation10 + $0x318] sm:$0xff] }
 0x5cd   :  { %v2146_v24 = vld [vmem:[#allocation10 + $0x338] sm:$0xff]  ;;  %v3518_v26 = vcombine.high %v2141_v21, %v2145_v22  ;;  %v3517_v31 = vcombine.low %v2141_v21, %v2145_v22 }
 0x5ce   :  { %v3520_v27 = vcombine.high %v2142_v23, %v2146_v24  ;;  %v3519_v32 = vcombine.low %v2142_v23, %v2146_v24 }
 0x5cf   :  { %2944 = vmatpush1.bf16.msra.mxu1 %v3453_v28  ;;  %2985 = vmatpush1.bf16.msra.mxu0 %v3455_v16  ;;  %v2149_v28 = vld [vmem:[#allocation10 + $0x350] sm:$0xff] }
 0x5d0   :  { %2945 = vmatprep.subr.bf16.mxu1 %v3462_v29  ;;  %2986 = vmatprep.subr.bf16.mxu0 %v3464_v30  ;;  %v2153_v16 = vld [vmem:[#allocation10 + $0x370] sm:$0xff]  ;;  %v2150_v29 = vld [vmem:[#allocation10 + $0x358] sm:$0xff] }
 0x5d1   :  { %v2154_v30 = vld [vmem:[#allocation10 + $0x378] sm:$0xff]  ;;  %v3526_v33 = vcombine.high %v2149_v28, %v2153_v16  ;;  %v3525_v38 = vcombine.low %v2149_v28, %v2153_v16 }
 0x5d2   :  { %v3528_v17 = vcombine.high %v2150_v29, %v2154_v30  ;;  %v3527_v39 = vcombine.low %v2150_v29, %v2154_v30 }
 0x5d3   :  { %2946 = vmatpush1.bf16.msra.mxu1 %v3461_v34  ;;  %2987 = vmatpush1.bf16.msra.mxu0 %v3463_v35  ;;  %v2157_v34 = vld [vmem:[#allocation10 + $0x390] sm:$0xff] }
 0x5d4   :  { %2947 = vmatprep.subr.bf16.mxu1 %v3470_v36  ;;  %2988 = vmatprep.subr.bf16.mxu0 %v3472_v37  ;;  %v2161_v35 = vld [vmem:[#allocation10 + $0x3b0] sm:$0xff]  ;;  %v2158_v36 = vld [vmem:[#allocation10 + $0x398] sm:$0xff] }
 0x5d5   :  { %v2162_v37 = vld [vmem:[#allocation10 + $0x3b8] sm:$0xff]  ;;  %v3534_v5 = vcombine.high %v2157_v34, %v2161_v35  ;;  %v3533_v43 = vcombine.low %v2157_v34, %v2161_v35 }
 0x5d6   :  { %v3536_v6 = vcombine.high %v2158_v36, %v2162_v37  ;;  %v3535_v44 = vcombine.low %v2158_v36, %v2162_v37 }
 0x5d7   :  { %2948 = vmatpush1.bf16.msra.mxu1 %v3469_v8  ;;  %2989 = vmatpush1.bf16.msra.mxu0 %v3471_v40  ;;  %v2165_v8 = vld [vmem:[#allocation10 + $0x3d0] sm:$0xff] }
 0x5d8   :  { %2949 = vmatprep.subr.bf16.mxu1 %v3478_v41  ;;  %2990 = vmatprep.subr.bf16.mxu0 %v3480_v42  ;;  %v2169_v40 = vld [vmem:[#allocation10 + $0x3f0] sm:$0xff]  ;;  %v2166_v41 = vld [vmem:[#allocation10 + $0x3d8] sm:$0xff] }
 0x5d9   :  { %v2170_v42 = vld [vmem:[#allocation10 + $0x3f8] sm:$0xff]  ;;  %v3542_v45 = vcombine.high %v2165_v8, %v2169_v40 }
 0x5da   :  { %v3544_v46 = vcombine.high %v2166_v41, %v2170_v42 }
 0x5db   :  { %2950 = vmatpush1.bf16.msra.mxu1 %v3477_v47  ;;  %2991 = vmatpush1.bf16.msra.mxu0 %v3479_v48  ;;  %v3541_v47 = vcombine.low %v2165_v8, %v2169_v40  ;;  %v3543_v48 = vcombine.low %v2166_v41, %v2170_v42 }
 0x5dc   :  { %2951 = vmatprep.subr.bf16.mxu1 %v3486_v49  ;;  %2992 = vmatprep.subr.bf16.mxu0 %v3488_v50 }
 0x5df   :  { %2952 = vmatpush1.bf16.msra.mxu1 %v3485_v56  ;;  %2993 = vmatpush1.bf16.msra.mxu0 %v3487_v57 }
 0x5e0   :  { %2953 = vmatprep.subr.bf16.mxu1 %v3494_v58  ;;  %2994 = vmatprep.subr.bf16.mxu0 %v3496_v59 }
 0x5e3   :  { %2954 = vmatpush1.bf16.msra.mxu1 %v3493_v2  ;;  %2995 = vmatpush1.bf16.msra.mxu0 %v3495_v3 }
 0x5e4   :  { %2955 = vmatprep.subr.bf16.mxu1 %v3502_v4  ;;  %2996 = vmatprep.subr.bf16.mxu0 %v3504_v7 }
 0x5e7   :  { %2956 = vmatpush1.bf16.msra.mxu1 %v3501_v15  ;;  %2997 = vmatpush1.bf16.msra.mxu0 %v3503_v18 }
 0x5e8   :  { %2957 = vmatprep.subr.bf16.mxu1 %v3510_v19  ;;  %2998 = vmatprep.subr.bf16.mxu0 %v3512_v20 }
 0x5eb   :  { %2958 = vmatpush1.bf16.msra.mxu1 %v3509_v12  ;;  %2999 = vmatpush1.bf16.msra.mxu0 %v3511_v25 }
 0x5ec   :  { %2959 = vmatprep.subr.bf16.mxu1 %v3518_v26  ;;  %3000 = vmatprep.subr.bf16.mxu0 %v3520_v27 }
 0x5ef   :  { %2960 = vmatpush1.bf16.msra.mxu1 %v3517_v31  ;;  %3001 = vmatpush1.bf16.msra.mxu0 %v3519_v32 }
 0x5f0   :  { %2961 = vmatprep.subr.bf16.mxu1 %v3526_v33  ;;  %3002 = vmatprep.subr.bf16.mxu0 %v3528_v17 }
 0x5f3   :  { %2962 = vmatpush1.bf16.msra.mxu1 %v3525_v38  ;;  %3003 = vmatpush1.bf16.msra.mxu0 %v3527_v39 }
 0x5f4   :  { %2963 = vmatprep.subr.bf16.mxu1 %v3534_v5  ;;  %3004 = vmatprep.subr.bf16.mxu0 %v3536_v6 }
 0x5f7   :  { %2964 = vmatpush1.bf16.msra.mxu1 %v3533_v43  ;;  %3005 = vmatpush1.bf16.msra.mxu0 %v3535_v44 }
 0x5f8   :  { %2965 = vmatprep.subr.bf16.mxu1 %v3542_v45  ;;  %3006 = vmatprep.subr.bf16.mxu0 %v3544_v46 }
 0x5fb   :  { %2966 = vmatpush1.bf16.msra.mxu1 %v3541_v47  ;;  %3007 = vmatpush1.bf16.msra.mxu0 %v3543_v48 }
 0x5fe   :  { %2968 = vmatmul.mubr.bf16.vlgmr.msra.gmra.mrb[20].mxu1 %v4453_v53  ;;  %3009 = vmatmul.mubr.bf16.vlgmr.msra.gmra.mrb[8].mxu0 %v4453_v53 }
 0x5ff   :  { %4094 = shalt.err (!%p4091_p2)
}
 0x600   :  { %s4095_s3 = scalar_lea.hbm %s4537_s15, 32 }
 0x601   :  { %p4096_p3 = scmp.ne.s32.totalorder %s4537_s15, %s4095_s3  ;;  %p4099_p4 = scmp.lt.u32.totalorder %s4095_s3, %s4537_s15 }
 0x603   :  { %p4101_p5 = pnand %p4099_p4, %p4096_p3 }
 0x605   :  { %4104 = shalt.err (!%p4101_p5)
}
 0x606   :  { %3153 = dma.vmem_to_hbm [thread:$0]  %s3151_s27, 32, %s4537_s15, [#allocation4]  }
 0x607   :  { %s4105_s17 = scalar_lea.vmem %s3161_s29, 32  ;;  %p4110_p7 = scmp.lt.s32.totalorder %s3161_s29, %s3161_s29 }
 0x608   :  { %p4106_p6 = scmp.ne.s32.totalorder %s3161_s29, %s4105_s17  ;;  %p4111_p8 = scmp.lt.s32.totalorder %s4105_s17, %s4105_s17 }
 0x60a   :  { %p4112_p9 = por %p4111_p8, %p4110_p7 }
 0x60c   :  { %p4113_p10 = pnand %p4112_p9, %p4106_p6 }
 0x60e   :  { %4116 = shalt.err (!%p4113_p10)
}
 0x60f   :  { %s4117_s26 = scalar_lea.hbm %s4538_s16, 32 }
 0x610   :  { %p4118_p11 = scmp.ne.s32.totalorder %s4538_s16, %s4117_s26  ;;  %p4121_p12 = scmp.lt.u32.totalorder %s4117_s26, %s4538_s16 }
 0x612   :  { %p4123_p13 = pnand %p4121_p12, %p4118_p11 }
 0x614   :  { %4126 = shalt.err (!%p4123_p13)
}
 0x615   :  { %3163 = dma.vmem_to_hbm [thread:$0]  %s3161_s29, 32, %s4538_s16, [#allocation13]   ;;  %v2183_v53 = vsub.s32 2, %v4322_v13  ;;  %v4487_v49 = vld [vmem:[%s4535_s13] sm:$0xff]  ;;  %v2187_v50 = vsub.s32 3, %v4322_v13  ;;  %v2191_v42 = vsub.s32 4, %v4322_v13 }
 0x616   :  { %v2176_v51 = vrot.slane %v4487_v49, %v4361_v62  ;;  %v2180_v54 = vrot.slane %v4487_v49, %v4367_v0  ;;  %v4150_v26 = vmov 1966171168   ;;  %v2199_v43 = vsub.s32 6, %v4322_v13 }
 0x617   :  { %v2184_v52 = vrot.slane %v4487_v49, %v2183_v53  ;;  %v2188_v55 = vrot.slane %v4487_v49, %v2187_v50  ;;  %v3094_v27 = vunpack.c.l.s4 %v4150_v26  ;;  %v2195_v44 = vsub.s32 5, %v4322_v13 }
 0x618   :  { %v2203_v45 = vsub.s32 7, %v4322_v13  ;;  %v2192_v46 = vrot.slane %v4487_v49, %v2191_v42  ;;  %v2200_v47 = vrot.slane %v4487_v49, %v2199_v43 }
 0x619   :  { %v3095_v30 = vunpack.c.0.s8 %v3094_v27  ;;  %v2196_v48 = vrot.slane %v4487_v49, %v2195_v44 }
 0x61a   :  { %v2204_v53 = vrot.slane %v4487_v49, %v2203_v45 }
 0x61b   :  { %v4497_v38 = vsub.s32 %v3095_v30, %v4322_v13 }
 0x691   :  { %v2887_v56 = vpop.f32.mrb[16].mxu1  ;;  %v2928_v57 = vpop.f32.mrb[4].mxu0 }
 0x692   :  { %v2888_v58 = vadd.f32 %v2887_v56, %v2176_v51  ;;  %v2929_v59 = vadd.f32 %v2928_v57, %v2184_v52  ;;  %v2889_v60 = vpop.f32.mrb[17].mxu1  ;;  %v2930_v61 = vpop.f32.mrb[5].mxu0 }
 0x693   :  { %v2890_v63 = vadd.f32 %v2889_v60, %v2180_v54  ;;  %v2931_v1 = vadd.f32 %v2930_v61, %v2188_v55  ;;  %v2891_v2 = vpop.f32.mrb[18].mxu1  ;;  %v2932_v3 = vpop.f32.mrb[6].mxu0 }
 0x694   :  { %v3017_v4 = vsub.f32 0.0, %v2888_v58  ;;  %v3019_v7 = vsub.f32 0.0, %v2929_v59  ;;  %v2892_v62 = vpop.f32.mrb[19].mxu1  ;;  %v2933_v9 = vpop.f32.mrb[7].mxu0 }
 0x695   :  { %v3018_v10 = vsub.f32 0.0, %v2890_v63  ;;  %v3020_v11 = vsub.f32 0.0, %v2931_v1 }
 0x696   :  { %v3025_v14 = vmul.f32 1.442695, %v3017_v4  ;;  %v3029_v0 = vmul.f32 1.442695, %v3019_v7 }
 0x697   :  { %v3027_v15 = vmul.f32 1.442695, %v3018_v10  ;;  %v3031_v18 = vmul.f32 1.442695, %v3020_v11 }
 0x698   :  { %3941 = vpow2.f32 %v3025_v14 }
 0x699   :  { %3943 = vpow2.f32 %v3029_v0 }
 0x69a   :  { %3945 = vpow2.f32 %v3027_v15 }
 0x69b   :  { %3947 = vpow2.f32 %v3031_v18 }
 0x6a2   :  { %v3942_v19 = vpop.eup %3941 }
 0x6a3   :  { %v3944_v20 = vpop.eup %3943  ;;  %v3041_v21 = vadd.f32 1.0, %v3942_v19 }
 0x6a4   :  { %v3946_v22 = vpop.eup %3945  ;;  %v3043_v23 = vadd.f32 1.0, %v3944_v20 }
 0x6a5   :  { %v3948_v24 = vpop.eup %3947  ;;  %3949 = vrcp.f32 %v3041_v21  ;;  %v3042_v12 = vadd.f32 1.0, %v3946_v22 }
 0x6a6   :  { %3951 = vrcp.f32 %v3043_v23  ;;  %v3044_v25 = vadd.f32 1.0, %v3948_v24 }
 0x6a7   :  { %3953 = vrcp.f32 %v3042_v12 }
 0x6a8   :  { %3955 = vrcp.f32 %v3044_v25 }
 0x6af   :  { %v3950_v28 = vpop.eup %3949 }
 0x6b0   :  { %v3952_v16 = vpop.eup %3951  ;;  %v3057_v29 = vmax.f32 %v3950_v28, 0.0 }
 0x6b1   :  { %v3954_v31 = vpop.eup %3953  ;;  %v3059_v32 = vmax.f32 %v3952_v16, 0.0 }
 0x6b2   :  { %v3956_v33 = vpop.eup %3955  ;;  %v3065_v17 = vmin.f32 %v3057_v29, 1.0  ;;  %v3058_v34 = vmax.f32 %v3954_v31, 0.0 }
 0x6b3   :  { %v3067_v35 = vmin.f32 %v3059_v32, 1.0  ;;  %v3060_v36 = vmax.f32 %v3956_v33, 0.0 }
 0x6b4   :  { %v3066_v37 = vmin.f32 %v3058_v34, 1.0 }
 0x6b5   :  { %v3068_v39 = vmin.f32 %v3060_v36, 1.0 }
 0x6b6   :  { %v3545_v5 = vpack.c.bf16 %v3066_v37, %v3065_v17 }
 0x6b7   :  { %v3546_v6 = vpack.c.bf16 %v3068_v39, %v3067_v35 }
 0x6b8   :  { %v4500_v8 = vrot.slane %v3545_v5, %v4497_v38 }
 0x6b9   :  { %v4503_v40 = vrot.slane %v3546_v6, %v4497_v38 }
 0x6bb   :  { %v3121_v41 = vcombine.low %v4500_v8, %v4503_v40 }
 0x6bd   :  { %v3129_v34 = vrot.slane %v3121_v41, %v4497_v38 }
 0x6d1   :  { %v2969_v50 = vpop.f32.mrb[20].mxu1  ;;  %v3010_v51 = vpop.f32.mrb[8].mxu0 }
 0x6d2   :  { %v2970_v52 = vadd.f32 %v2969_v50, %v2192_v46  ;;  %v3011_v54 = vadd.f32 %v3010_v51, %v2200_v47  ;;  %v2971_v55 = vpop.f32.mrb[21].mxu1  ;;  %v3012_v56 = vpop.f32.mrb[9].mxu0 }
 0x6d3   :  { %v2972_v57 = vadd.f32 %v2971_v55, %v2196_v48  ;;  %v3013_v58 = vadd.f32 %v3012_v56, %v2204_v53  ;;  %v2973_v59 = vpop.f32.mrb[22].mxu1  ;;  %v3014_v60 = vpop.f32.mrb[10].mxu0 }
 0x6d4   :  { %v3021_v61 = vsub.f32 0.0, %v2970_v52  ;;  %v3023_v13 = vsub.f32 0.0, %v3011_v54  ;;  %v2974_v63 = vpop.f32.mrb[23].mxu1  ;;  %v3015_v1 = vpop.f32.mrb[11].mxu0 }
 0x6d5   :  { %v3022_v2 = vsub.f32 0.0, %v2972_v57  ;;  %v3024_v3 = vsub.f32 0.0, %v3013_v58 }
 0x6d6   :  { %v3033_v4 = vmul.f32 1.442695, %v3021_v61  ;;  %v3037_v7 = vmul.f32 1.442695, %v3023_v13 }
 0x6d7   :  { %v3035_v62 = vmul.f32 1.442695, %v3022_v2  ;;  %v3039_v49 = vmul.f32 1.442695, %v3024_v3 }
 0x6d8   :  { %3957 = vpow2.f32 %v3033_v4 }
 0x6d9   :  { %3959 = vpow2.f32 %v3037_v7 }
 0x6da   :  { %3961 = vpow2.f32 %v3035_v62 }
 0x6db   :  { %3963 = vpow2.f32 %v3039_v49 }
 0x6e2   :  { %v3958_v9 = vpop.eup %3957 }
 0x6e3   :  { %v3960_v10 = vpop.eup %3959  ;;  %v3045_v11 = vadd.f32 1.0, %v3958_v9 }
 0x6e4   :  { %v3962_v14 = vpop.eup %3961  ;;  %v3047_v0 = vadd.f32 1.0, %v3960_v10 }
 0x6e5   :  { %v3964_v15 = vpop.eup %3963  ;;  %3965 = vrcp.f32 %v3045_v11  ;;  %v3046_v18 = vadd.f32 1.0, %v3962_v14 }
 0x6e6   :  { %3967 = vrcp.f32 %v3047_v0  ;;  %v3048_v19 = vadd.f32 1.0, %v3964_v15 }
 0x6e7   :  { %3969 = vrcp.f32 %v3046_v18 }
 0x6e8   :  { %3971 = vrcp.f32 %v3048_v19 }
 0x6ef   :  { %v3966_v20 = vpop.eup %3965 }
 0x6f0   :  { %v3968_v21 = vpop.eup %3967  ;;  %v3061_v22 = vmax.f32 %v3966_v20, 0.0 }
 0x6f1   :  { %v3970_v23 = vpop.eup %3969  ;;  %v3063_v24 = vmax.f32 %v3968_v21, 0.0 }
 0x6f2   :  { %v3972_v12 = vpop.eup %3971  ;;  %v3069_v25 = vmin.f32 %v3061_v22, 1.0  ;;  %v3062_v26 = vmax.f32 %v3970_v23, 0.0 }
 0x6f3   :  { %v3071_v27 = vmin.f32 %v3063_v24, 1.0  ;;  %v3064_v28 = vmax.f32 %v3972_v12, 0.0 }
 0x6f4   :  { %v3070_v16 = vmin.f32 %v3062_v26, 1.0 }
 0x6f5   :  { %v3072_v29 = vmin.f32 %v3064_v28, 1.0 }
 0x6f6   :  { %v3547_v30 = vpack.c.bf16 %v3070_v16, %v3069_v25 }
 0x6f7   :  { %v3548_v31 = vpack.c.bf16 %v3072_v29, %v3071_v27 }
 0x6f8   :  { %v3113_v32 = vrot.slane %v3547_v30, %v4497_v38 }
 0x6f9   :  { %v3120_v33 = vrot.slane %v3548_v31, %v4497_v38 }
 0x6fb   :  { %v3122_v17 = vcombine.low %v3113_v32, %v3120_v33 }
 0x6fd   :  { %v3136_v35 = vrot.slane %v3122_v17, %v4497_v38 }
 0x6ff   :  { %v3137_v36 = vcombine.low %v3129_v34, %v3136_v35 }
 0x701   :  { %3139 = vst [vmem:[%s4536_s14] sm:$0xff] %v3137_v36 }
 0x702   :  { %4133 = dma.done.wait [#allocation4], 32  }
 0x703   :  { %4134 = vsyncadd [#allocation4], 4294967264 }
 0x704   :  { %4135 = dma.done.wait [#allocation13], 32  }
 0x705   :  { %4136 = vsyncadd [#allocation13], 4294967264 }
 0x706   :  { %3172 = vsyncpa [#allocation3], 1 }
 0x707   :  { %3173 = vsyncpa [#allocation6], 1 }
 0x708   :  { %3174 = vsyncpa [#allocation9], 1 }
 0x709   :  { %3175 = vsyncpa [#allocation4], 1 }
 0x70a   :  { %3176 = vsyncpa [#allocation13], 1 }

</bundles_post_ra>
